<compile_context>
chip_gen: v6e
topology: v6e:2x2x1
jax: 0.10.0
libtpu: 0.0.40
codegen_flags: <defaults>
</compile_context>

<pallas_src>
import functools

import jax
import jax.numpy as jnp
from jax import lax
from jax.experimental import pallas as pl
from jax.experimental.pallas import tpu as pltpu


def _round_up(n, m):
    return (n + m - 1) // m * m


def _cdiv(a, b):
    return (a + b - 1) // b


# ---------------------------------------------------------------------------
# Kernel
# ---------------------------------------------------------------------------
def _mdnrnn_kernel(x_ref, wih_ref, whh_ref, b_ref, whead_ref, bhead_ref,
                   out_ref, gx_ref, *, seq_len, k_pad, ko_pad):
    """One batch block: full LSTM recurrence + fused MDN heads on the last h."""
    Bb = out_ref.shape[0]            # batch rows in this block (multiple of 8)
    Hp = whh_ref.shape[0]            # hidden size padded to a multiple of 128
    T = seq_len
    I = x_ref.shape[-1]

    # ---- Hoisted input projection + fused LSTM bias: ONE batched MXU push ----
    # Replaces T tiny (Bb, I)x(I, 4Hp) matmuls and T bias broadcasts that used
    # to sit on the serial, data-dependent critical path.
    x_all = x_ref[...].reshape(T * Bb, I)
    gx = (jnp.dot(x_all.astype(jnp.bfloat16), wih_ref[...],
                  preferred_element_type=jnp.float32)
          + b_ref[...])
    gx_ref[...] = gx.reshape(T, Bb, 4 * Hp)

    h0 = jnp.zeros((Bb, Hp), jnp.float32)
    c0 = jnp.zeros((Bb, Hp), jnp.float32)

    def step(t, carry):
        h, c = carry
        # Only the recurrent matmul remains inside the serial loop.
        gates = gx_ref[t] + jnp.dot(h.astype(jnp.bfloat16), whh_ref[...],
                                    preferred_element_type=jnp.float32)
        # PyTorch LSTM gate order (i, f, g, o); each gate has its own
        # 128-lane-aligned Hp-wide slab, so these slices are zero-cost.
        i_g = jax.nn.sigmoid(gates[:, 0 * Hp:1 * Hp])
        f_g = jax.nn.sigmoid(gates[:, 1 * Hp:2 * Hp])
        g_g = jnp.tanh(gates[:, 2 * Hp:3 * Hp])
        o_g = jax.nn.sigmoid(gates[:, 3 * Hp:4 * Hp])
        c_new = f_g * c + i_g * g_g
        h_new = o_g * jnp.tanh(c_new)
        return h_new, c_new

    # Modest unroll: every step depends on (h, c), so full unroll adds no ILP
    # once the x projection is hoisted -- it only inflates vreg live ranges.
    h_last, _ = lax.fori_loop(0, T, step, (h0, c0), unroll=min(T, 8))

    # ---- Fused MDN heads: one MXU push -> [pi-logits | mu | log-sigma] ----
    head = (jnp.dot(h_last.astype(jnp.bfloat16), whead_ref[...],
                    preferred_element_type=jnp.float32)
            + bhead_ref[...])

    logits = head[:, 0:k_pad]                 # padded columns carry bias -1e30
    m = jnp.max(logits, axis=-1, keepdims=True)
    e = jnp.exp(logits - m)
    denom = jnp.sum(e, axis=-1, keepdims=True)
    pi = e / denom                            # exact division ((Bb,1), ~free)

    mu = head[:, k_pad:k_pad + ko_pad]
    sg = jnp.exp(head[:, k_pad + ko_pad:k_pad + 2 * ko_pad])

    # Lane-dense, 128-aligned stores of the packed result slab.
    out_ref[:, 0:k_pad] = pi.astype(out_ref.dtype)
    out_ref[:, k_pad:k_pad + ko_pad] = mu.astype(out_ref.dtype)
    out_ref[:, k_pad + ko_pad:k_pad + 2 * ko_pad] = sg.astype(out_ref.dtype)


# ---------------------------------------------------------------------------
# One-time weight packing (NOT done per forward call)
# ---------------------------------------------------------------------------
def prepare_params(params):
    """Pad / fuse the model weights into MXU-friendly slabs once.

    Matmul operands are pre-cast to bf16 (f32 accumulation inside the kernel);
    biases and the -1e30 pi-padding sentinel stay f32.  Zero-padded weights
    keep the padded hidden units exactly 0 through the whole recurrence.
    Returns (prepped_arrays_dict, K, K*O).
    """
    f32, bf16 = jnp.float32, jnp.bfloat16
    I, H4 = params["w_ih"].shape
    H = H4 // 4
    K = params["w_pi"].shape[1]
    KO = params["w_mu"].shape[1]

    Hp = _round_up(H, 128)
    Kp = _round_up(K, 128)
    KOp = _round_up(KO, 128)
    W = Kp + 2 * KOp

    def pad_gates(w):                 # (R, 4*H) -> (R, 4*Hp), per-gate 128-slabs
        R = w.shape[0]
        w4 = w.astype(f32).reshape(R, 4, H)
        w4 = jnp.pad(w4, ((0, 0), (0, 0), (0, Hp - H)))
        return w4.reshape(R, 4 * Hp)

    w_ih_p = pad_gates(params["w_ih"]).astype(bf16)                  # (I, 4Hp)
    w_hh_p = jnp.pad(pad_gates(params["w_hh"]),
                     ((0, Hp - H), (0, 0))).astype(bf16)             # (Hp, 4Hp)
    bias_p = pad_gates(params["b_ih"] + params["b_hh"])              # (1, 4Hp) f32

    # MDN heads fused into one (Hp, Kp + 2*KOp) weight + bias.  Padded
    # pi-logit columns get bias -1e30 so the in-kernel softmax over the full
    # 128-wide slab gives them ~0 probability; mu/sigma padding is discarded.
    w_head = jnp.zeros((Hp, W), f32)
    w_head = w_head.at[:H, 0:K].set(params["w_pi"].astype(f32))
    w_head = w_head.at[:H, Kp:Kp + KO].set(params["w_mu"].astype(f32))
    w_head = w_head.at[:H, Kp + KOp:Kp + KOp + KO].set(params["w_sigma"].astype(f32))
    w_head = w_head.astype(bf16)

    b_head = jnp.zeros((1, W), f32)
    b_head = b_head.at[:, 0:Kp].set(-1e30)
    b_head = b_head.at[:, 0:K].set(params["b_pi"].astype(f32))
    b_head = b_head.at[:, Kp:Kp + KO].set(params["b_mu"].astype(f32))
    b_head = b_head.at[:, Kp + KOp:Kp + KOp + KO].set(params["b_sigma"].astype(f32))

    prepped = {"w_ih": w_ih_p, "w_hh": w_hh_p, "bias": bias_p,
               "w_head": w_head, "b_head": b_head}
    return prepped, K, KO


# ---------------------------------------------------------------------------
# Forward (called per step; only layout-cheap work outside the kernel)
# ---------------------------------------------------------------------------
def mdnrnn_wrapper_forward(x, prepped, *, K, KO, temperature=1.0):
    """Pallas-backed equivalent of MDNRNNWrapper.forward.

    Args:
      x: [B, T, I] float32 input sequence (batch_first, like the PyTorch module).
      prepped: output of prepare_params (padded/fused bf16 weights, f32 biases).
      K, KO: n_gaussians and n_gaussians*output_size (static python ints).
      temperature: python float.

    Returns:
      (pi_last [B, K], mu_last [B, KO], sigma_last [B, KO])
    """
    f32 = jnp.float32
    B, T, I = x.shape
    Hp = prepped["w_hh"].shape[0]
    Kp = _round_up(K, 128)
    KOp = _round_up(KO, 128)
    W = prepped["w_head"].shape[1]

    # Batch blocking: >= 2 blocks whenever the padded batch allows it so the
    # "parallel" grid axis can shard across v7x's two TensorCores
    # (no effect, and no harm, on single-TC v5e/v6e).
    Bp = _round_up(B, 8)
    if Bp >= 16:
        BB = min(128, max(8, _round_up(_cdiv(Bp, 2), 8)))
    else:
        BB = Bp
    Bp = _round_up(Bp, BB)
    nb = Bp // BB

    # Pad batch and go time-leading; each block's whole sequence lands in VMEM
    # with a single DMA, and the recurrence indexes its gates scratch along the
    # leading time axis.
    x_p = jnp.pad(x.astype(f32), ((0, Bp - B), (0, 0), (0, 0)))
    x_tbi = jnp.transpose(x_p, (1, 0, 2))            # (T, Bp, I)

    # Explicit VMEM budget: BlockSpec double-buffers every operand; add the
    # hoisted-projection scratch and a 2x margin for tile padding.  Capped at
    # v7x's 64 MiB physical VMEM (v5e/v6e have 128 MiB).
    vmem_bytes = 2 * (T * BB * I * 4          # x block (f32)
                      + I * 4 * Hp * 2        # w_ih  (bf16)
                      + Hp * 4 * Hp * 2       # w_hh  (bf16)
                      + 4 * Hp * 4            # fused LSTM bias (f32)
                      + Hp * W * 2            # fused head weight (bf16)
                      + W * 4                 # fused head bias (f32)
                      + BB * W * 4)           # packed output block (f32)
    vmem_bytes += T * BB * 4 * Hp * 4         # gates_x scratch (f32)
    vmem_limit = int(min(max(2 * vmem_bytes, 32 << 20), 64 << 20))

    kernel = functools.partial(_mdnrnn_kernel, seq_len=T, k_pad=Kp, ko_pad=KOp)

    out = pl.pallas_call(
        kernel,
        out_shape=jax.ShapeDtypeStruct((Bp, W), f32),
        grid_spec=pltpu.PrefetchScalarGridSpec(
            num_scalar_prefetch=0,
            grid=(nb,),      # batch blocks only; time is an in-kernel fori_loop
            in_specs=[
                pl.BlockSpec((T, BB, I), lambda b: (0, b, 0)),     # x (time-leading)
                pl.BlockSpec((I, 4 * Hp), lambda b: (0, 0)),       # w_ih (bf16, gate slabs)
                pl.BlockSpec((Hp, 4 * Hp), lambda b: (0, 0)),      # w_hh (bf16, gate slabs)
                pl.BlockSpec((1, 4 * Hp), lambda b: (0, 0)),       # fused LSTM bias (f32)
                pl.BlockSpec((Hp, W), lambda b: (0, 0)),           # fused head weight (bf16)
                pl.BlockSpec((1, W), lambda b: (0, 0)),            # fused head bias (f32)
            ],
            out_specs=pl.BlockSpec((BB, W), lambda b: (b, 0)),     # packed pi|mu|sigma
            scratch_shapes=[pltpu.VMEM((T, BB, 4 * Hp), f32)],     # hoisted x-projection
        ),
        compiler_params=pltpu.CompilerParams(
            dimension_semantics=("parallel",),   # batch blocks are independent
            vmem_limit_bytes=vmem_limit),
    )(x_tbi, prepped["w_ih"], prepped["w_hh"], prepped["bias"],
      prepped["w_head"], prepped["b_head"])

    pi = out[:B, 0:K]
    mu = out[:B, Kp:Kp + KO]
    sigma = out[:B, Kp + KOp:Kp + KOp + KO]

    if temperature != 1.0:
        # Matches the PyTorch wrapper exactly: re-softmax the already
        # normalized mixture weights scaled by 1/T (NOT softmax(logits/T)),
        # over the real K components only -> kept outside the kernel.
        pi = jax.nn.softmax(pi / temperature, axis=-1)
    return pi, mu, sigma


def init_params(key, input_size, hidden_size, n_gaussians, output_size):
    """Deterministic synthetic parameters (weights stored as [in, out])."""
    ks = jax.random.split(key, 11)
    s = 0.1
    return {
        "w_ih": s * jax.random.normal(ks[0], (input_size, 4 * hidden_size), jnp.float32),
        "w_hh": s * jax.random.normal(ks[1], (hidden_size, 4 * hidden_size), jnp.float32),
        "b_ih": s * jax.random.normal(ks[2], (1, 4 * hidden_size), jnp.float32),
        "b_hh": s * jax.random.normal(ks[3], (1, 4 * hidden_size), jnp.float32),
        "w_pi": s * jax.random.normal(ks[4], (hidden_size, n_gaussians), jnp.float32),
        "b_pi": s * jax.random.normal(ks[5], (1, n_gaussians), jnp.float32),
        "w_mu": s * jax.random.normal(ks[6], (hidden_size, n_gaussians * output_size), jnp.float32),
        "b_mu": s * jax.random.normal(ks[7], (1, n_gaussians * output_size), jnp.float32),
        "w_sigma": s * jax.random.normal(ks[8], (hidden_size, n_gaussians * output_size), jnp.float32),
        "b_sigma": s * jax.random.normal(ks[9], (1, n_gaussians * output_size), jnp.float32),
    }


if __name__ == "__main__":
    B, T, I = 2, 8, 16       # batch, seq_len, input_size
    H, K, O = 32, 5, 16      # hidden_size, n_gaussians, output_size

    key = jax.random.PRNGKey(0)
    k_x, k_p = jax.random.split(key)
    x = jax.random.normal(k_x, (B, T, I), jnp.float32)
    params = init_params(k_p, I, H, K, O)

    # One-time weight packing (cached across forward calls).
    prepped, K_, KO_ = prepare_params(params)

    fwd = jax.jit(functools.partial(mdnrnn_wrapper_forward,
                                    K=K_, KO=KO_, temperature=1.0))
    pi_last, mu_last, sigma_last = fwd(x, prepped)
    jax.block_until_ready((pi_last, mu_last, sigma_last))

    assert pi_last.shape == (B, K)
    assert mu_last.shape == (B, K * O)
    assert sigma_last.shape == (B, K * O)
    print("KERNEL_OK")
</pallas_src>

<mosaic_0001>
module attributes {stable_mosaic.version = 11 : i64} {
  func.func @_mdnrnn_kernel(%arg0: i32, %arg1: memref<8x8x16xf32, #tpu.memory_space<vmem>>, %arg2: memref<16x512xbf16, #tpu.memory_space<vmem>>, %arg3: memref<128x512xbf16, #tpu.memory_space<vmem>>, %arg4: memref<1x512xf32, #tpu.memory_space<vmem>>, %arg5: memref<128x384xbf16, #tpu.memory_space<vmem>>, %arg6: memref<1x384xf32, #tpu.memory_space<vmem>>, %arg7: memref<8x384xf32, #tpu.memory_space<vmem>>, %arg8: memref<8x8x512xf32, #tpu.memory_space<vmem>>) attributes {dimension_semantics = [#tpu.dimension_semantics<parallel>], iteration_bounds = array<i64: 1>, scalar_prefetch = 0 : i64, scratch_operands = 1 : i64, tpu.core_type = #tpu.core_type<tc>, window_params = [{transform_indices = @transform_0, window_bounds = array<i64: 8, 8, 16>}, {pipeline_mode = #tpu.pipeline_mode<synchronous>, transform_indices = @transform_1, window_bounds = array<i64: 16, 512>}, {pipeline_mode = #tpu.pipeline_mode<synchronous>, transform_indices = @transform_2, window_bounds = array<i64: 128, 512>}, {pipeline_mode = #tpu.pipeline_mode<synchronous>, transform_indices = @transform_3, window_bounds = array<i64: 1, 512>}, {pipeline_mode = #tpu.pipeline_mode<synchronous>, transform_indices = @transform_4, window_bounds = array<i64: 128, 384>}, {pipeline_mode = #tpu.pipeline_mode<synchronous>, transform_indices = @transform_5, window_bounds = array<i64: 1, 384>}, {transform_indices = @transform_6, window_bounds = array<i64: 8, 384>}]} {
    %c0 = arith.constant 0 : index
    %c0_0 = arith.constant 0 : index
    %c0_1 = arith.constant 0 : index
    %0 = vector.load %arg1[%c0, %c0_0, %c0_1] : memref<8x8x16xf32, #tpu.memory_space<vmem>>, vector<8x8x16xf32>
    %1 = vector.shape_cast %0 : vector<8x8x16xf32> to vector<64x16xf32>
    %2 = arith.truncf %1 : vector<64x16xf32> to vector<64x16xbf16>
    %c0_2 = arith.constant 0 : index
    %c0_3 = arith.constant 0 : index
    %3 = vector.load %arg2[%c0_2, %c0_3] : memref<16x512xbf16, #tpu.memory_space<vmem>>, vector<16x512xbf16>
    %cst = arith.constant dense<0.000000e+00> : vector<64x512xf32>
    %4 = tpu.matmul %2, %3, %cst {dimension_numbers = #tpu.dot_dimension_numbers<[1], [0], [0], [1], [0, 0, 1, 1], [], []>} : vector<64x16xbf16>, vector<16x512xbf16>, vector<64x512xf32> -> vector<64x512xf32>
    %c0_4 = arith.constant 0 : index
    %c0_5 = arith.constant 0 : index
    %5 = vector.load %arg4[%c0_4, %c0_5] : memref<1x512xf32, #tpu.memory_space<vmem>>, vector<1x512xf32>
    %6 = vector.broadcast %5 : vector<1x512xf32> to vector<64x512xf32>
    %7 = arith.addf %4, %6 : vector<64x512xf32>
    %8 = vector.shape_cast %7 : vector<64x512xf32> to vector<8x8x512xf32>
    %c0_6 = arith.constant 0 : index
    %c0_7 = arith.constant 0 : index
    %c0_8 = arith.constant 0 : index
    %9 = vector.load %arg8[%c0_6, %c0_7, %c0_8] : memref<8x8x512xf32, #tpu.memory_space<vmem>>, vector<8x8x512xf32>
    tpu.vector_store %arg8[%c0_6, %c0_7, %c0_8], %8 {strides = array<i32>} : memref<8x8x512xf32, #tpu.memory_space<vmem>>, vector<8x8x512xf32>,
    %cst_9 = arith.constant 0.000000e+00 : f32
    %10 = vector.broadcast %cst_9 : f32 to vector<8x128xf32>
    %cst_10 = arith.constant 0.000000e+00 : f32
    %11 = vector.broadcast %cst_10 : f32 to vector<8x128xf32>
    %c0_i32 = arith.constant 0 : i32
    %12 = arith.index_cast %c0_i32 : i32 to index
    %c0_11 = arith.constant 0 : index
    %c0_12 = arith.constant 0 : index
    %13 = vector.load %arg8[%12, %c0_11, %c0_12] : memref<8x8x512xf32, #tpu.memory_space<vmem>>, vector<1x8x512xf32>
    %14 = vector.shape_cast %13 : vector<1x8x512xf32> to vector<8x512xf32>
    %15 = arith.truncf %10 : vector<8x128xf32> to vector<8x128xbf16>
    %c0_13 = arith.constant 0 : index
    %c0_14 = arith.constant 0 : index
    %16 = vector.load %arg3[%c0_13, %c0_14] : memref<128x512xbf16, #tpu.memory_space<vmem>>, vector<128x512xbf16>
    %cst_15 = arith.constant dense<0.000000e+00> : vector<8x512xf32>
    %17 = tpu.matmul %15, %16, %cst_15 {dimension_numbers = #tpu.dot_dimension_numbers<[1], [0], [0], [1], [0, 0, 1, 1], [], []>} : vector<8x128xbf16>, vector<128x512xbf16>, vector<8x512xf32> -> vector<8x512xf32>
    %18 = arith.addf %14, %17 : vector<8x512xf32>
    %19 = vector.extract_strided_slice %18 {offsets = [0, 0], sizes = [8, 128], strides = [1, 1]} : vector<8x512xf32> to vector<8x128xf32>
    %20 = arith.negf %19 : vector<8x128xf32>
    %21 = math.exp %20 : vector<8x128xf32>
    %cst_16 = arith.constant 1.000000e+00 : f32
    %22 = vector.broadcast %cst_16 : f32 to vector<8x128xf32>
    %23 = arith.addf %22, %21 : vector<8x128xf32>
    %24 = arith.divf %22, %23 : vector<8x128xf32>
    %25 = vector.extract_strided_slice %18 {offsets = [0, 128], sizes = [8, 128], strides = [1, 1]} : vector<8x512xf32> to vector<8x128xf32>
    %26 = arith.negf %25 : vector<8x128xf32>
    %27 = math.exp %26 : vector<8x128xf32>
    %cst_17 = arith.constant 1.000000e+00 : f32
    %28 = vector.broadcast %cst_17 : f32 to vector<8x128xf32>
    %29 = arith.addf %28, %27 : vector<8x128xf32>
    %30 = arith.divf %28, %29 : vector<8x128xf32>
    %31 = vector.extract_strided_slice %18 {offsets = [0, 256], sizes = [8, 128], strides = [1, 1]} : vector<8x512xf32> to vector<8x128xf32>
    %32 = math.tanh %31 : vector<8x128xf32>
    %33 = vector.extract_strided_slice %18 {offsets = [0, 384], sizes = [8, 128], strides = [1, 1]} : vector<8x512xf32> to vector<8x128xf32>
    %34 = arith.negf %33 : vector<8x128xf32>
    %35 = math.exp %34 : vector<8x128xf32>
    %cst_18 = arith.constant 1.000000e+00 : f32
    %36 = vector.broadcast %cst_18 : f32 to vector<8x128xf32>
    %37 = arith.addf %36, %35 : vector<8x128xf32>
    %38 = arith.divf %36, %37 : vector<8x128xf32>
    %39 = arith.mulf %30, %11 : vector<8x128xf32>
    %40 = arith.mulf %24, %32 : vector<8x128xf32>
    %41 = arith.addf %39, %40 : vector<8x128xf32>
    %42 = math.tanh %41 : vector<8x128xf32>
    %43 = arith.mulf %38, %42 : vector<8x128xf32>
    %c1_i32 = arith.constant 1 : i32
    %44 = arith.index_cast %c1_i32 : i32 to index
    %c0_19 = arith.constant 0 : index
    %c0_20 = arith.constant 0 : index
    %45 = vector.load %arg8[%44, %c0_19, %c0_20] : memref<8x8x512xf32, #tpu.memory_space<vmem>>, vector<1x8x512xf32>
    %46 = vector.shape_cast %45 : vector<1x8x512xf32> to vector<8x512xf32>
    %47 = arith.truncf %43 : vector<8x128xf32> to vector<8x128xbf16>
    %c0_21 = arith.constant 0 : index
    %c0_22 = arith.constant 0 : index
    %48 = vector.load %arg3[%c0_21, %c0_22] : memref<128x512xbf16, #tpu.memory_space<vmem>>, vector<128x512xbf16>
    %cst_23 = arith.constant dense<0.000000e+00> : vector<8x512xf32>
    %49 = tpu.matmul %47, %48, %cst_23 {dimension_numbers = #tpu.dot_dimension_numbers<[1], [0], [0], [1], [0, 0, 1, 1], [], []>} : vector<8x128xbf16>, vector<128x512xbf16>, vector<8x512xf32> -> vector<8x512xf32>
    %50 = arith.addf %46, %49 : vector<8x512xf32>
    %51 = vector.extract_strided_slice %50 {offsets = [0, 0], sizes = [8, 128], strides = [1, 1]} : vector<8x512xf32> to vector<8x128xf32>
    %52 = arith.negf %51 : vector<8x128xf32>
    %53 = math.exp %52 : vector<8x128xf32>
    %cst_24 = arith.constant 1.000000e+00 : f32
    %54 = vector.broadcast %cst_24 : f32 to vector<8x128xf32>
    %55 = arith.addf %54, %53 : vector<8x128xf32>
    %56 = arith.divf %54, %55 : vector<8x128xf32>
    %57 = vector.extract_strided_slice %50 {offsets = [0, 128], sizes = [8, 128], strides = [1, 1]} : vector<8x512xf32> to vector<8x128xf32>
    %58 = arith.negf %57 : vector<8x128xf32>
    %59 = math.exp %58 : vector<8x128xf32>
    %cst_25 = arith.constant 1.000000e+00 : f32
    %60 = vector.broadcast %cst_25 : f32 to vector<8x128xf32>
    %61 = arith.addf %60, %59 : vector<8x128xf32>
    %62 = arith.divf %60, %61 : vector<8x128xf32>
    %63 = vector.extract_strided_slice %50 {offsets = [0, 256], sizes = [8, 128], strides = [1, 1]} : vector<8x512xf32> to vector<8x128xf32>
    %64 = math.tanh %63 : vector<8x128xf32>
    %65 = vector.extract_strided_slice %50 {offsets = [0, 384], sizes = [8, 128], strides = [1, 1]} : vector<8x512xf32> to vector<8x128xf32>
    %66 = arith.negf %65 : vector<8x128xf32>
    %67 = math.exp %66 : vector<8x128xf32>
    %cst_26 = arith.constant 1.000000e+00 : f32
    %68 = vector.broadcast %cst_26 : f32 to vector<8x128xf32>
    %69 = arith.addf %68, %67 : vector<8x128xf32>
    %70 = arith.divf %68, %69 : vector<8x128xf32>
    %71 = arith.mulf %62, %41 : vector<8x128xf32>
    %72 = arith.mulf %56, %64 : vector<8x128xf32>
    %73 = arith.addf %71, %72 : vector<8x128xf32>
    %74 = math.tanh %73 : vector<8x128xf32>
    %75 = arith.mulf %70, %74 : vector<8x128xf32>
    %c2_i32 = arith.constant 2 : i32
    %76 = arith.index_cast %c2_i32 : i32 to index
    %c0_27 = arith.constant 0 : index
    %c0_28 = arith.constant 0 : index
    %77 = vector.load %arg8[%76, %c0_27, %c0_28] : memref<8x8x512xf32, #tpu.memory_space<vmem>>, vector<1x8x512xf32>
    %78 = vector.shape_cast %77 : vector<1x8x512xf32> to vector<8x512xf32>
    %79 = arith.truncf %75 : vector<8x128xf32> to vector<8x128xbf16>
    %c0_29 = arith.constant 0 : index
    %c0_30 = arith.constant 0 : index
    %80 = vector.load %arg3[%c0_29, %c0_30] : memref<128x512xbf16, #tpu.memory_space<vmem>>, vector<128x512xbf16>
    %cst_31 = arith.constant dense<0.000000e+00> : vector<8x512xf32>
    %81 = tpu.matmul %79, %80, %cst_31 {dimension_numbers = #tpu.dot_dimension_numbers<[1], [0], [0], [1], [0, 0, 1, 1], [], []>} : vector<8x128xbf16>, vector<128x512xbf16>, vector<8x512xf32> -> vector<8x512xf32>
    %82 = arith.addf %78, %81 : vector<8x512xf32>
    %83 = vector.extract_strided_slice %82 {offsets = [0, 0], sizes = [8, 128], strides = [1, 1]} : vector<8x512xf32> to vector<8x128xf32>
    %84 = arith.negf %83 : vector<8x128xf32>
    %85 = math.exp %84 : vector<8x128xf32>
    %cst_32 = arith.constant 1.000000e+00 : f32
    %86 = vector.broadcast %cst_32 : f32 to vector<8x128xf32>
    %87 = arith.addf %86, %85 : vector<8x128xf32>
    %88 = arith.divf %86, %87 : vector<8x128xf32>
    %89 = vector.extract_strided_slice %82 {offsets = [0, 128], sizes = [8, 128], strides = [1, 1]} : vector<8x512xf32> to vector<8x128xf32>
    %90 = arith.negf %89 : vector<8x128xf32>
    %91 = math.exp %90 : vector<8x128xf32>
    %cst_33 = arith.constant 1.000000e+00 : f32
    %92 = vector.broadcast %cst_33 : f32 to vector<8x128xf32>
    %93 = arith.addf %92, %91 : vector<8x128xf32>
    %94 = arith.divf %92, %93 : vector<8x128xf32>
    %95 = vector.extract_strided_slice %82 {offsets = [0, 256], sizes = [8, 128], strides = [1, 1]} : vector<8x512xf32> to vector<8x128xf32>
    %96 = math.tanh %95 : vector<8x128xf32>
    %97 = vector.extract_strided_slice %82 {offsets = [0, 384], sizes = [8, 128], strides = [1, 1]} : vector<8x512xf32> to vector<8x128xf32>
    %98 = arith.negf %97 : vector<8x128xf32>
    %99 = math.exp %98 : vector<8x128xf32>
    %cst_34 = arith.constant 1.000000e+00 : f32
    %100 = vector.broadcast %cst_34 : f32 to vector<8x128xf32>
    %101 = arith.addf %100, %99 : vector<8x128xf32>
    %102 = arith.divf %100, %101 : vector<8x128xf32>
    %103 = arith.mulf %94, %73 : vector<8x128xf32>
    %104 = arith.mulf %88, %96 : vector<8x128xf32>
    %105 = arith.addf %103, %104 : vector<8x128xf32>
    %106 = math.tanh %105 : vector<8x128xf32>
    %107 = arith.mulf %102, %106 : vector<8x128xf32>
    %c3_i32 = arith.constant 3 : i32
    %108 = arith.index_cast %c3_i32 : i32 to index
    %c0_35 = arith.constant 0 : index
    %c0_36 = arith.constant 0 : index
    %109 = vector.load %arg8[%108, %c0_35, %c0_36] : memref<8x8x512xf32, #tpu.memory_space<vmem>>, vector<1x8x512xf32>
    %110 = vector.shape_cast %109 : vector<1x8x512xf32> to vector<8x512xf32>
    %111 = arith.truncf %107 : vector<8x128xf32> to vector<8x128xbf16>
    %c0_37 = arith.constant 0 : index
    %c0_38 = arith.constant 0 : index
    %112 = vector.load %arg3[%c0_37, %c0_38] : memref<128x512xbf16, #tpu.memory_space<vmem>>, vector<128x512xbf16>
    %cst_39 = arith.constant dense<0.000000e+00> : vector<8x512xf32>
    %113 = tpu.matmul %111, %112, %cst_39 {dimension_numbers = #tpu.dot_dimension_numbers<[1], [0], [0], [1], [0, 0, 1, 1], [], []>} : vector<8x128xbf16>, vector<128x512xbf16>, vector<8x512xf32> -> vector<8x512xf32>
    %114 = arith.addf %110, %113 : vector<8x512xf32>
    %115 = vector.extract_strided_slice %114 {offsets = [0, 0], sizes = [8, 128], strides = [1, 1]} : vector<8x512xf32> to vector<8x128xf32>
    %116 = arith.negf %115 : vector<8x128xf32>
    %117 = math.exp %116 : vector<8x128xf32>
    %cst_40 = arith.constant 1.000000e+00 : f32
    %118 = vector.broadcast %cst_40 : f32 to vector<8x128xf32>
    %119 = arith.addf %118, %117 : vector<8x128xf32>
    %120 = arith.divf %118, %119 : vector<8x128xf32>
    %121 = vector.extract_strided_slice %114 {offsets = [0, 128], sizes = [8, 128], strides = [1, 1]} : vector<8x512xf32> to vector<8x128xf32>
    %122 = arith.negf %121 : vector<8x128xf32>
    %123 = math.exp %122 : vector<8x128xf32>
    %cst_41 = arith.constant 1.000000e+00 : f32
    %124 = vector.broadcast %cst_41 : f32 to vector<8x128xf32>
    %125 = arith.addf %124, %123 : vector<8x128xf32>
    %126 = arith.divf %124, %125 : vector<8x128xf32>
    %127 = vector.extract_strided_slice %114 {offsets = [0, 256], sizes = [8, 128], strides = [1, 1]} : vector<8x512xf32> to vector<8x128xf32>
    %128 = math.tanh %127 : vector<8x128xf32>
    %129 = vector.extract_strided_slice %114 {offsets = [0, 384], sizes = [8, 128], strides = [1, 1]} : vector<8x512xf32> to vector<8x128xf32>
    %130 = arith.negf %129 : vector<8x128xf32>
    %131 = math.exp %130 : vector<8x128xf32>
    %cst_42 = arith.constant 1.000000e+00 : f32
    %132 = vector.broadcast %cst_42 : f32 to vector<8x128xf32>
    %133 = arith.addf %132, %131 : vector<8x128xf32>
    %134 = arith.divf %132, %133 : vector<8x128xf32>
    %135 = arith.mulf %126, %105 : vector<8x128xf32>
    %136 = arith.mulf %120, %128 : vector<8x128xf32>
    %137 = arith.addf %135, %136 : vector<8x128xf32>
    %138 = math.tanh %137 : vector<8x128xf32>
    %139 = arith.mulf %134, %138 : vector<8x128xf32>
    %c4_i32 = arith.constant 4 : i32
    %140 = arith.index_cast %c4_i32 : i32 to index
    %c0_43 = arith.constant 0 : index
    %c0_44 = arith.constant 0 : index
    %141 = vector.load %arg8[%140, %c0_43, %c0_44] : memref<8x8x512xf32, #tpu.memory_space<vmem>>, vector<1x8x512xf32>
    %142 = vector.shape_cast %141 : vector<1x8x512xf32> to vector<8x512xf32>
    %143 = arith.truncf %139 : vector<8x128xf32> to vector<8x128xbf16>
    %c0_45 = arith.constant 0 : index
    %c0_46 = arith.constant 0 : index
    %144 = vector.load %arg3[%c0_45, %c0_46] : memref<128x512xbf16, #tpu.memory_space<vmem>>, vector<128x512xbf16>
    %cst_47 = arith.constant dense<0.000000e+00> : vector<8x512xf32>
    %145 = tpu.matmul %143, %144, %cst_47 {dimension_numbers = #tpu.dot_dimension_numbers<[1], [0], [0], [1], [0, 0, 1, 1], [], []>} : vector<8x128xbf16>, vector<128x512xbf16>, vector<8x512xf32> -> vector<8x512xf32>
    %146 = arith.addf %142, %145 : vector<8x512xf32>
    %147 = vector.extract_strided_slice %146 {offsets = [0, 0], sizes = [8, 128], strides = [1, 1]} : vector<8x512xf32> to vector<8x128xf32>
    %148 = arith.negf %147 : vector<8x128xf32>
    %149 = math.exp %148 : vector<8x128xf32>
    %cst_48 = arith.constant 1.000000e+00 : f32
    %150 = vector.broadcast %cst_48 : f32 to vector<8x128xf32>
    %151 = arith.addf %150, %149 : vector<8x128xf32>
    %152 = arith.divf %150, %151 : vector<8x128xf32>
    %153 = vector.extract_strided_slice %146 {offsets = [0, 128], sizes = [8, 128], strides = [1, 1]} : vector<8x512xf32> to vector<8x128xf32>
    %154 = arith.negf %153 : vector<8x128xf32>
    %155 = math.exp %154 : vector<8x128xf32>
    %cst_49 = arith.constant 1.000000e+00 : f32
    %156 = vector.broadcast %cst_49 : f32 to vector<8x128xf32>
    %157 = arith.addf %156, %155 : vector<8x128xf32>
    %158 = arith.divf %156, %157 : vector<8x128xf32>
    %159 = vector.extract_strided_slice %146 {offsets = [0, 256], sizes = [8, 128], strides = [1, 1]} : vector<8x512xf32> to vector<8x128xf32>
    %160 = math.tanh %159 : vector<8x128xf32>
    %161 = vector.extract_strided_slice %146 {offsets = [0, 384], sizes = [8, 128], strides = [1, 1]} : vector<8x512xf32> to vector<8x128xf32>
    %162 = arith.negf %161 : vector<8x128xf32>
    %163 = math.exp %162 : vector<8x128xf32>
    %cst_50 = arith.constant 1.000000e+00 : f32
    %164 = vector.broadcast %cst_50 : f32 to vector<8x128xf32>
    %165 = arith.addf %164, %163 : vector<8x128xf32>
    %166 = arith.divf %164, %165 : vector<8x128xf32>
    %167 = arith.mulf %158, %137 : vector<8x128xf32>
    %168 = arith.mulf %152, %160 : vector<8x128xf32>
    %169 = arith.addf %167, %168 : vector<8x128xf32>
    %170 = math.tanh %169 : vector<8x128xf32>
    %171 = arith.mulf %166, %170 : vector<8x128xf32>
    %c5_i32 = arith.constant 5 : i32
    %172 = arith.index_cast %c5_i32 : i32 to index
    %c0_51 = arith.constant 0 : index
    %c0_52 = arith.constant 0 : index
    %173 = vector.load %arg8[%172, %c0_51, %c0_52] : memref<8x8x512xf32, #tpu.memory_space<vmem>>, vector<1x8x512xf32>
    %174 = vector.shape_cast %173 : vector<1x8x512xf32> to vector<8x512xf32>
    %175 = arith.truncf %171 : vector<8x128xf32> to vector<8x128xbf16>
    %c0_53 = arith.constant 0 : index
    %c0_54 = arith.constant 0 : index
    %176 = vector.load %arg3[%c0_53, %c0_54] : memref<128x512xbf16, #tpu.memory_space<vmem>>, vector<128x512xbf16>
    %cst_55 = arith.constant dense<0.000000e+00> : vector<8x512xf32>
    %177 = tpu.matmul %175, %176, %cst_55 {dimension_numbers = #tpu.dot_dimension_numbers<[1], [0], [0], [1], [0, 0, 1, 1], [], []>} : vector<8x128xbf16>, vector<128x512xbf16>, vector<8x512xf32> -> vector<8x512xf32>
    %178 = arith.addf %174, %177 : vector<8x512xf32>
    %179 = vector.extract_strided_slice %178 {offsets = [0, 0], sizes = [8, 128], strides = [1, 1]} : vector<8x512xf32> to vector<8x128xf32>
    %180 = arith.negf %179 : vector<8x128xf32>
    %181 = math.exp %180 : vector<8x128xf32>
    %cst_56 = arith.constant 1.000000e+00 : f32
    %182 = vector.broadcast %cst_56 : f32 to vector<8x128xf32>
    %183 = arith.addf %182, %181 : vector<8x128xf32>
    %184 = arith.divf %182, %183 : vector<8x128xf32>
    %185 = vector.extract_strided_slice %178 {offsets = [0, 128], sizes = [8, 128], strides = [1, 1]} : vector<8x512xf32> to vector<8x128xf32>
    %186 = arith.negf %185 : vector<8x128xf32>
    %187 = math.exp %186 : vector<8x128xf32>
    %cst_57 = arith.constant 1.000000e+00 : f32
    %188 = vector.broadcast %cst_57 : f32 to vector<8x128xf32>
    %189 = arith.addf %188, %187 : vector<8x128xf32>
    %190 = arith.divf %188, %189 : vector<8x128xf32>
    %191 = vector.extract_strided_slice %178 {offsets = [0, 256], sizes = [8, 128], strides = [1, 1]} : vector<8x512xf32> to vector<8x128xf32>
    %192 = math.tanh %191 : vector<8x128xf32>
    %193 = vector.extract_strided_slice %178 {offsets = [0, 384], sizes = [8, 128], strides = [1, 1]} : vector<8x512xf32> to vector<8x128xf32>
    %194 = arith.negf %193 : vector<8x128xf32>
    %195 = math.exp %194 : vector<8x128xf32>
    %cst_58 = arith.constant 1.000000e+00 : f32
    %196 = vector.broadcast %cst_58 : f32 to vector<8x128xf32>
    %197 = arith.addf %196, %195 : vector<8x128xf32>
    %198 = arith.divf %196, %197 : vector<8x128xf32>
    %199 = arith.mulf %190, %169 : vector<8x128xf32>
    %200 = arith.mulf %184, %192 : vector<8x128xf32>
    %201 = arith.addf %199, %200 : vector<8x128xf32>
    %202 = math.tanh %201 : vector<8x128xf32>
    %203 = arith.mulf %198, %202 : vector<8x128xf32>
    %c6_i32 = arith.constant 6 : i32
    %204 = arith.index_cast %c6_i32 : i32 to index
    %c0_59 = arith.constant 0 : index
    %c0_60 = arith.constant 0 : index
    %205 = vector.load %arg8[%204, %c0_59, %c0_60] : memref<8x8x512xf32, #tpu.memory_space<vmem>>, vector<1x8x512xf32>
    %206 = vector.shape_cast %205 : vector<1x8x512xf32> to vector<8x512xf32>
    %207 = arith.truncf %203 : vector<8x128xf32> to vector<8x128xbf16>
    %c0_61 = arith.constant 0 : index
    %c0_62 = arith.constant 0 : index
    %208 = vector.load %arg3[%c0_61, %c0_62] : memref<128x512xbf16, #tpu.memory_space<vmem>>, vector<128x512xbf16>
    %cst_63 = arith.constant dense<0.000000e+00> : vector<8x512xf32>
    %209 = tpu.matmul %207, %208, %cst_63 {dimension_numbers = #tpu.dot_dimension_numbers<[1], [0], [0], [1], [0, 0, 1, 1], [], []>} : vector<8x128xbf16>, vector<128x512xbf16>, vector<8x512xf32> -> vector<8x512xf32>
    %210 = arith.addf %206, %209 : vector<8x512xf32>
    %211 = vector.extract_strided_slice %210 {offsets = [0, 0], sizes = [8, 128], strides = [1, 1]} : vector<8x512xf32> to vector<8x128xf32>
    %212 = arith.negf %211 : vector<8x128xf32>
    %213 = math.exp %212 : vector<8x128xf32>
    %cst_64 = arith.constant 1.000000e+00 : f32
    %214 = vector.broadcast %cst_64 : f32 to vector<8x128xf32>
    %215 = arith.addf %214, %213 : vector<8x128xf32>
    %216 = arith.divf %214, %215 : vector<8x128xf32>
    %217 = vector.extract_strided_slice %210 {offsets = [0, 128], sizes = [8, 128], strides = [1, 1]} : vector<8x512xf32> to vector<8x128xf32>
    %218 = arith.negf %217 : vector<8x128xf32>
    %219 = math.exp %218 : vector<8x128xf32>
    %cst_65 = arith.constant 1.000000e+00 : f32
    %220 = vector.broadcast %cst_65 : f32 to vector<8x128xf32>
    %221 = arith.addf %220, %219 : vector<8x128xf32>
    %222 = arith.divf %220, %221 : vector<8x128xf32>
    %223 = vector.extract_strided_slice %210 {offsets = [0, 256], sizes = [8, 128], strides = [1, 1]} : vector<8x512xf32> to vector<8x128xf32>
    %224 = math.tanh %223 : vector<8x128xf32>
    %225 = vector.extract_strided_slice %210 {offsets = [0, 384], sizes = [8, 128], strides = [1, 1]} : vector<8x512xf32> to vector<8x128xf32>
    %226 = arith.negf %225 : vector<8x128xf32>
    %227 = math.exp %226 : vector<8x128xf32>
    %cst_66 = arith.constant 1.000000e+00 : f32
    %228 = vector.broadcast %cst_66 : f32 to vector<8x128xf32>
    %229 = arith.addf %228, %227 : vector<8x128xf32>
    %230 = arith.divf %228, %229 : vector<8x128xf32>
    %231 = arith.mulf %222, %201 : vector<8x128xf32>
    %232 = arith.mulf %216, %224 : vector<8x128xf32>
    %233 = arith.addf %231, %232 : vector<8x128xf32>
    %234 = math.tanh %233 : vector<8x128xf32>
    %235 = arith.mulf %230, %234 : vector<8x128xf32>
    %c7_i32 = arith.constant 7 : i32
    %236 = arith.index_cast %c7_i32 : i32 to index
    %c0_67 = arith.constant 0 : index
    %c0_68 = arith.constant 0 : index
    %237 = vector.load %arg8[%236, %c0_67, %c0_68] : memref<8x8x512xf32, #tpu.memory_space<vmem>>, vector<1x8x512xf32>
    %238 = vector.shape_cast %237 : vector<1x8x512xf32> to vector<8x512xf32>
    %239 = arith.truncf %235 : vector<8x128xf32> to vector<8x128xbf16>
    %c0_69 = arith.constant 0 : index
    %c0_70 = arith.constant 0 : index
    %240 = vector.load %arg3[%c0_69, %c0_70] : memref<128x512xbf16, #tpu.memory_space<vmem>>, vector<128x512xbf16>
    %cst_71 = arith.constant dense<0.000000e+00> : vector<8x512xf32>
    %241 = tpu.matmul %239, %240, %cst_71 {dimension_numbers = #tpu.dot_dimension_numbers<[1], [0], [0], [1], [0, 0, 1, 1], [], []>} : vector<8x128xbf16>, vector<128x512xbf16>, vector<8x512xf32> -> vector<8x512xf32>
    %242 = arith.addf %238, %241 : vector<8x512xf32>
    %243 = vector.extract_strided_slice %242 {offsets = [0, 0], sizes = [8, 128], strides = [1, 1]} : vector<8x512xf32> to vector<8x128xf32>
    %244 = arith.negf %243 : vector<8x128xf32>
    %245 = math.exp %244 : vector<8x128xf32>
    %cst_72 = arith.constant 1.000000e+00 : f32
    %246 = vector.broadcast %cst_72 : f32 to vector<8x128xf32>
    %247 = arith.addf %246, %245 : vector<8x128xf32>
    %248 = arith.divf %246, %247 : vector<8x128xf32>
    %249 = vector.extract_strided_slice %242 {offsets = [0, 128], sizes = [8, 128], strides = [1, 1]} : vector<8x512xf32> to vector<8x128xf32>
    %250 = arith.negf %249 : vector<8x128xf32>
    %251 = math.exp %250 : vector<8x128xf32>
    %cst_73 = arith.constant 1.000000e+00 : f32
    %252 = vector.broadcast %cst_73 : f32 to vector<8x128xf32>
    %253 = arith.addf %252, %251 : vector<8x128xf32>
    %254 = arith.divf %252, %253 : vector<8x128xf32>
    %255 = vector.extract_strided_slice %242 {offsets = [0, 256], sizes = [8, 128], strides = [1, 1]} : vector<8x512xf32> to vector<8x128xf32>
    %256 = math.tanh %255 : vector<8x128xf32>
    %257 = vector.extract_strided_slice %242 {offsets = [0, 384], sizes = [8, 128], strides = [1, 1]} : vector<8x512xf32> to vector<8x128xf32>
    %258 = arith.negf %257 : vector<8x128xf32>
    %259 = math.exp %258 : vector<8x128xf32>
    %cst_74 = arith.constant 1.000000e+00 : f32
    %260 = vector.broadcast %cst_74 : f32 to vector<8x128xf32>
    %261 = arith.addf %260, %259 : vector<8x128xf32>
    %262 = arith.divf %260, %261 : vector<8x128xf32>
    %263 = arith.mulf %254, %233 : vector<8x128xf32>
    %264 = arith.mulf %248, %256 : vector<8x128xf32>
    %265 = arith.addf %263, %264 : vector<8x128xf32>
    %266 = math.tanh %265 : vector<8x128xf32>
    %267 = arith.mulf %262, %266 : vector<8x128xf32>
    %c8_i32 = arith.constant 8 : i32
    %268 = arith.truncf %267 : vector<8x128xf32> to vector<8x128xbf16>
    %c0_75 = arith.constant 0 : index
    %c0_76 = arith.constant 0 : index
    %269 = vector.load %arg5[%c0_75, %c0_76] : memref<128x384xbf16, #tpu.memory_space<vmem>>, vector<128x384xbf16>
    %cst_77 = arith.constant dense<0.000000e+00> : vector<8x384xf32>
    %270 = tpu.matmul %268, %269, %cst_77 {dimension_numbers = #tpu.dot_dimension_numbers<[1], [0], [0], [1], [0, 0, 1, 1], [], []>} : vector<8x128xbf16>, vector<128x384xbf16>, vector<8x384xf32> -> vector<8x384xf32>
    %c0_78 = arith.constant 0 : index
    %c0_79 = arith.constant 0 : index
    %271 = vector.load %arg6[%c0_78, %c0_79] : memref<1x384xf32, #tpu.memory_space<vmem>>, vector<1x384xf32>
    %272 = vector.broadcast %271 : vector<1x384xf32> to vector<8x384xf32>
    %273 = arith.addf %270, %272 : vector<8x384xf32>
    %274 = vector.extract_strided_slice %273 {offsets = [0, 0], sizes = [8, 128], strides = [1, 1]} : vector<8x384xf32> to vector<8x128xf32>
    %cst_80 = arith.constant dense<0xFF800000> : vector<8xf32>
    %275 = vector.multi_reduction <maximumf>, %274, %cst_80 [1] : vector<8x128xf32> to vector<8xf32>
    %276 = vector.shape_cast %275 : vector<8xf32> to vector<8x1xf32>
    %277 = vector.broadcast %276 : vector<8x1xf32> to vector<8x128xf32>
    %278 = arith.subf %274, %277 : vector<8x128xf32>
    %279 = math.exp %278 : vector<8x128xf32>
    %cst_81 = arith.constant dense<0.000000e+00> : vector<8xf32>
    %280 = vector.multi_reduction <add>, %279, %cst_81 [1] : vector<8x128xf32> to vector<8xf32>
    %281 = vector.shape_cast %280 : vector<8xf32> to vector<8x1xf32>
    %282 = vector.broadcast %281 : vector<8x1xf32> to vector<8x128xf32>
    %283 = arith.divf %279, %282 : vector<8x128xf32>
    %284 = vector.extract_strided_slice %273 {offsets = [0, 128], sizes = [8, 128], strides = [1, 1]} : vector<8x384xf32> to vector<8x128xf32>
    %285 = vector.extract_strided_slice %273 {offsets = [0, 256], sizes = [8, 128], strides = [1, 1]} : vector<8x384xf32> to vector<8x128xf32>
    %286 = math.exp %285 : vector<8x128xf32>
    %c0_82 = arith.constant 0 : index
    %c0_83 = arith.constant 0 : index
    %287 = vector.load %arg7[%c0_82, %c0_83] : memref<8x384xf32, #tpu.memory_space<vmem>>, vector<8x128xf32>
    tpu.vector_store %arg7[%c0_82, %c0_83], %283 {strides = array<i32>} : memref<8x384xf32, #tpu.memory_space<vmem>>, vector<8x128xf32>,
    %c0_84 = arith.constant 0 : index
    %c128 = arith.constant 128 : index
    %288 = vector.load %arg7[%c0_84, %c128] : memref<8x384xf32, #tpu.memory_space<vmem>>, vector<8x128xf32>
    tpu.vector_store %arg7[%c0_84, %c128], %284 {strides = array<i32>} : memref<8x384xf32, #tpu.memory_space<vmem>>, vector<8x128xf32>,
    %c0_85 = arith.constant 0 : index
    %c256 = arith.constant 256 : index
    %289 = vector.load %arg7[%c0_85, %c256] : memref<8x384xf32, #tpu.memory_space<vmem>>, vector<8x128xf32>
    tpu.vector_store %arg7[%c0_85, %c256], %286 {strides = array<i32>} : memref<8x384xf32, #tpu.memory_space<vmem>>, vector<8x128xf32>,
    return
  }
  func.func @transform_0(%arg0: i32) -> (i32, i32, i32) {
    %c0_i32 = arith.constant 0 : i32
    %c0_i32_0 = arith.constant 0 : i32
    %c0_i32_1 = arith.constant 0 : i32
    return %c0_i32, %arg0, %c0_i32_0 : i32, i32, i32
  }
  func.func @transform_1(%arg0: i32) -> (i32, i32) {
    %c0_i32 = arith.constant 0 : i32
    %c0_i32_0 = arith.constant 0 : i32
    %c0_i32_1 = arith.constant 0 : i32
    return %c0_i32, %c0_i32_0 : i32, i32
  }
  func.func @transform_2(%arg0: i32) -> (i32, i32) {
    %c0_i32 = arith.constant 0 : i32
    %c0_i32_0 = arith.constant 0 : i32
    %c0_i32_1 = arith.constant 0 : i32
    return %c0_i32, %c0_i32_0 : i32, i32
  }
  func.func @transform_3(%arg0: i32) -> (i32, i32) {
    %c0_i32 = arith.constant 0 : i32
    %c0_i32_0 = arith.constant 0 : i32
    %c0_i32_1 = arith.constant 0 : i32
    return %c0_i32, %c0_i32_0 : i32, i32
  }
  func.func @transform_4(%arg0: i32) -> (i32, i32) {
    %c0_i32 = arith.constant 0 : i32
    %c0_i32_0 = arith.constant 0 : i32
    %c0_i32_1 = arith.constant 0 : i32
    return %c0_i32, %c0_i32_0 : i32, i32
  }
  func.func @transform_5(%arg0: i32) -> (i32, i32) {
    %c0_i32 = arith.constant 0 : i32
    %c0_i32_0 = arith.constant 0 : i32
    %c0_i32_1 = arith.constant 0 : i32
    return %c0_i32, %c0_i32_0 : i32, i32
  }
  func.func @transform_6(%arg0: i32) -> (i32, i32) {
    %c0_i32 = arith.constant 0 : i32
    %c0_i32_0 = arith.constant 0 : i32
    return %arg0, %c0_i32 : i32, i32
  }
}

</mosaic_0001>

<bundles_post_ra>
// kernel: mdnrnn_wrapper_forward.1
= control target key start
LH: loop header
LB: loop body
LE: loop exit
PB: predicated region body
PF: predicated region fallthrough
CT: control target
= control target key end

     0   :  { %11 = vsyncpa [#allocation4], 0  ;;  %s2806_s0 = inlined_call_operand.vmem [shape: f32[8,8,16], index: 0, kind: input, shape index: {}]   ;;  %s2807_s1 = inlined_call_operand.vmem [shape: bf16[16,512], index: 1, kind: input, shape index: {}]   ;;  %s2808_s2 = inlined_call_operand.hbm [shape: bf16[128,512], index: 2, kind: input, shape index: {}]   ;;  %s2809_s3 = inlined_call_operand.vmem [shape: f32[1,512], index: 3, kind: input, shape index: {}]   ;;  %s2810_s4 = inlined_call_operand.hbm [shape: bf16[128,384], index: 4, kind: input, shape index: {}]   ;;  %s2811_s5 = inlined_call_operand.vmem [shape: f32[1,384], index: 5, kind: input, shape index: {}]   ;;  %s2812_s6 = inlined_call_operand.vmem [shape: f32[8,384], index: 6, kind: output, shape index: {}]  }
   0x1   :  { %12 = vsyncpa [#allocation6], 0  ;;  %s2124_s21 = smov [#allocation3]  }
   0x2   :  { %s22_s22 = sshll.u32 %s2124_s21, 4  ;;  %s23_s22 = int_to_ptr.vmem [resolvable:$true] %s22_s22 }
   0x3   :  { %s2088_s23 = scalar_lea.vmem %s23_s22, 4096  ;;  %p2093_p1 = scmp.lt.s32.totalorder %s23_s22, %s23_s22 }
   0x4   :  { %p2089_p0 = scmp.ne.s32.totalorder %s23_s22, %s2088_s23  ;;  %p2094_p2 = scmp.lt.s32.totalorder %s2088_s23, %s2088_s23 }
   0x6   :  { %p2095_p3 = por %p2094_p2, %p2093_p1 }
   0x8   :  { %p2096_p4 = pnand %p2095_p3, %p2089_p0 }
   0xa   :  { %2099 = shalt.err (!%p2096_p4)
}
   0xb   :  { %s2125_s24 = smov 256   ;;  %s2126_s25 = smov 16  }
   0xc   :  { %28 = dma.hbm_to_vmem [thread:$0]  %s2808_s2, 4096, %s23_s22, [#allocation4], %s2125_s24, %s2125_s24, %s2126_s25  }
   0xd   :  { %s2127_s28 = smov [#allocation5]  }
   0xe   :  { %s36_s29 = sshll.u32 %s2127_s28, 4  ;;  %s37_s29 = int_to_ptr.vmem [resolvable:$true] %s36_s29 }
   0xf   :  { %s2108_s30 = scalar_lea.vmem %s37_s29, 3072  ;;  %p2113_p6 = scmp.lt.s32.totalorder %s37_s29, %s37_s29 }
  0x10   :  { %p2109_p5 = scmp.ne.s32.totalorder %s37_s29, %s2108_s30  ;;  %p2114_p7 = scmp.lt.s32.totalorder %s2108_s30, %s2108_s30 }
  0x12   :  { %p2115_p8 = por %p2114_p7, %p2113_p6 }
  0x14   :  { %p2116_p9 = pnand %p2115_p8, %p2109_p5 }
  0x16   :  { %2119 = shalt.err (!%p2116_p9)
}
  0x17   :  { %s2128_s7 = smov 192   ;;  %s2129_s8 = smov 12  }
  0x18   :  { %42 = dma.hbm_to_vmem [thread:$0]  %s2810_s4, 3072, %s37_s29, [#allocation6], %s2128_s7, %s2128_s7, %s2129_s8  }
  0x19   :  { %2120 = dma.done.wait [#allocation4], 4096  }
  0x1a   :  { %2121 = vsyncadd [#allocation4], 4294963200 }
  0x1b   :  { %2122 = dma.done.wait [#allocation6], 3072  }
  0x1c   :  { %2123 = vsyncadd [#allocation6], 4294964224  ;;  %v2816_v0 = vmov 0   ;;  %v1828_v1 = vld [vmem:[%s2807_s1 + $0x4] ss:$16 sps:$4 sm:$0xff]   ;;  %v53_v6 = vld [vmem:[%s2806_s0 + $0x8] sm:$0xff]  ;;  %v70_v49 = vlaneseq }
  0x1d   :  { %155 = vmatprep.mubr.bf16.mxu0 %v2816_v0  ;;  %228 = vmatprep.mubr.bf16.mxu1 %v2816_v0  ;;  %v1830_v2 = vld [vmem:[%s2807_s1 + $0xc] ss:$16 sps:$4 sm:$0xff]   ;;  %v1832_v3 = vld [vmem:[%s2807_s1] ss:$16 sps:$4 sm:$0xff]   ;;  %v1833_v4 = vld [vmem:[%s2807_s1 + $0x8] ss:$16 sps:$4 sm:$0xff]  }
  0x1e   :  { %137 = vmatprep.subr.bf16.mxu0 %v1828_v1  ;;  %v52_v5 = vld [vmem:[%s2806_s0] sm:$0xff]  ;;  %210 = vmatprep.subr.bf16.mxu1 %v1830_v2  ;;  %vm110_vm0 = vcmask 130048   ;;  %v2196_v9 = vld [vmem:[#allocation3 + $0xec] ss:$16 sps:$4 sm:$0xff]   ;;  %v2200_v11 = vld [vmem:[#allocation3 + $0xe8] ss:$16 sps:$4 sm:$0xff]  }
  0x1f   :  { %138 = vmatpush1.bf16.msra.mxu0 %v1832_v3  ;;  %211 = vmatpush1.bf16.msra.mxu1 %v1833_v4  ;;  %v60_v7 = vpack.c.bf16 %v53_v6, %v52_v5  ;;  %v2194_v8 = vld [vmem:[#allocation3 + $0xe4] ss:$16 sps:$4 sm:$0xff]   ;;  %v2198_v10 = vld [vmem:[#allocation3 + $0xe0] ss:$16 sps:$4 sm:$0xff]   ;;  %v2207_v13 = vld [vmem:[#allocation3 + $0xcc] ss:$16 sps:$4 sm:$0xff]  }
  0x20   :  { %497 = vmatprep.subr.bf16.mxu0 %v2194_v8  ;;  %v2203_v12 = vld [vmem:[#allocation3 + $0xc4] ss:$16 sps:$4 sm:$0xff]   ;;  %538 = vmatprep.subr.bf16.mxu1 %v2196_v9  ;;  %v2211_v14 = vld [vmem:[#allocation3 + $0xc0] ss:$16 sps:$4 sm:$0xff]   ;;  %v2213_v15 = vld [vmem:[#allocation3 + $0xc8] ss:$16 sps:$4 sm:$0xff]  }
  0x21   :  { %v54_v16 = vld [vmem:[%s2806_s0 + $0x10] sm:$0xff]  ;;  %v55_v17 = vld [vmem:[%s2806_s0 + $0x18] sm:$0xff]  ;;  %v56_v26 = vld [vmem:[%s2806_s0 + $0x20] sm:$0xff]  ;;  %v2362_v50 = vshrl.u32 %v70_v49, 7  ;;  %vm2132_vm1 = vmmov 0  }
  0x22   :  { %1702 = vmatmul.mubr.msk.bf16.vlgmr.msra.gmra.mxu0 %vm110_vm0, %v60_v7  ;;  %1706 = vmatmul.mubr.msk.bf16.vlgmr.msra.gmra.mxu1 %vm110_vm0, %v60_v7  ;;  %v2225_v18 = vld [vmem:[#allocation3 + $0xa4] ss:$16 sps:$4 sm:$0xff]   ;;  %v61_v19 = vpack.c.bf16 %v55_v17, %v54_v16  ;;  %v2228_v20 = vld [vmem:[#allocation3 + $0xac] ss:$16 sps:$4 sm:$0xff]   ;;  %v2230_v21 = vld [vmem:[#allocation3 + $0xa0] ss:$16 sps:$4 sm:$0xff]  }
  0x23   :  { %498 = vmatpush1.bf16.msra.mxu0 %v2198_v10  ;;  %539 = vmatpush1.bf16.msra.mxu1 %v2200_v11  ;;  %v2233_v22 = vld [vmem:[#allocation3 + $0xa8] ss:$16 sps:$4 sm:$0xff]   ;;  %v2237_v23 = vld [vmem:[#allocation3 + $0x84] ss:$16 sps:$4 sm:$0xff]   ;;  %v2240_v24 = vld [vmem:[#allocation3 + $0x8c] ss:$16 sps:$4 sm:$0xff]  }
  0x24   :  { %499 = vmatprep.subr.bf16.mxu0 %v2203_v12  ;;  %540 = vmatprep.subr.bf16.mxu1 %v2207_v13  ;;  %v2242_v25 = vld [vmem:[#allocation3 + $0x80] ss:$16 sps:$4 sm:$0xff]   ;;  %v57_v27 = vld [vmem:[%s2806_s0 + $0x28] sm:$0xff]  ;;  %v2258_v29 = vld [vmem:[#allocation3 + $0x64] ss:$16 sps:$4 sm:$0xff]   ;;  %2820 = vst [vmem:[#allocation9_spill] sm:$0xff] %v2362_v50 }
  0x25   :  { %165 = vmatprep.mubr.bf16.mxu0 %v2816_v0  ;;  %238 = vmatprep.mubr.bf16.mxu1 %v2816_v0  ;;  %v2256_v28 = vld [vmem:[#allocation3 + $0x88] ss:$16 sps:$4 sm:$0xff]   ;;  %v2262_v30 = vld [vmem:[#allocation3 + $0x6c] ss:$16 sps:$4 sm:$0xff]   ;;  %v62_v31 = vpack.c.bf16 %v57_v27, %v56_v26  ;;  %v2265_v32 = vld [vmem:[#allocation3 + $0x60] ss:$16 sps:$4 sm:$0xff]  }
  0x26   :  { %v2267_v33 = vld [vmem:[#allocation3 + $0x68] ss:$16 sps:$4 sm:$0xff]   ;;  %v2271_v34 = vld [vmem:[#allocation3 + $0x44] ss:$16 sps:$4 sm:$0xff]   ;;  %v2274_v35 = vld [vmem:[#allocation3 + $0x4c] ss:$16 sps:$4 sm:$0xff]  }
  0x27   :  { %500 = vmatpush1.bf16.msra.mxu0 %v2211_v14  ;;  %541 = vmatpush1.bf16.msra.mxu1 %v2213_v15  ;;  %v2278_v36 = vld [vmem:[#allocation3 + $0x40] ss:$16 sps:$4 sm:$0xff]   ;;  %v2280_v37 = vld [vmem:[#allocation3 + $0x48] ss:$16 sps:$4 sm:$0xff]   ;;  %v2292_v40 = vld [vmem:[#allocation3 + $0x24] ss:$16 sps:$4 sm:$0xff]  }
  0x28   :  { %501 = vmatprep.subr.bf16.mxu0 %v2225_v18  ;;  %542 = vmatprep.subr.bf16.mxu1 %v2228_v20  ;;  %v58_v38 = vld [vmem:[%s2806_s0 + $0x30] sm:$0xff]  ;;  %v59_v39 = vld [vmem:[%s2806_s0 + $0x38] sm:$0xff]  ;;  %v2814_v51 = vsub.s32 2, %v2362_v50  ;;  %v2815_v52 = vsub.s32 0, %v2362_v50  ;;  %v84_v53 = vsub.s32 3, %v2362_v50  ;;  %v2813_v58 = vsub.s32 1, %v2362_v50 }
  0x29   :  { %v2296_v41 = vld [vmem:[#allocation3 + $0x2c] ss:$16 sps:$4 sm:$0xff]   ;;  %v2298_v42 = vld [vmem:[#allocation3 + $0x20] ss:$16 sps:$4 sm:$0xff]   ;;  %v63_v43 = vpack.c.bf16 %v59_v39, %v58_v38  ;;  %v2300_v44 = vld [vmem:[#allocation3 + $0x28] ss:$16 sps:$4 sm:$0xff]  }
  0x2a   :  { %1703 = vmatmul.mubr.msk.bf16.gmra.mxu0 %vm110_vm0, %v61_v19  ;;  %1707 = vmatmul.mubr.msk.bf16.gmra.mxu1 %vm110_vm0, %v61_v19  ;;  %v2302_v45 = vld [vmem:[#allocation3 + $0x4] ss:$16 sps:$4 sm:$0xff]   ;;  %v2305_v46 = vld [vmem:[#allocation3 + $0xc] ss:$16 sps:$4 sm:$0xff]   ;;  %v2310_v47 = vld [vmem:[#allocation3] ss:$16 sps:$4 sm:$0xff]  }
  0x2b   :  { %502 = vmatpush1.bf16.msra.mxu0 %v2230_v21  ;;  %175 = vmatprep.mubr.bf16.mxu0 %v2816_v0  ;;  %v2314_v48 = vld [vmem:[#allocation3 + $0x8] ss:$16 sps:$4 sm:$0xff]   ;;  %v68_v54 = vld [vmem:[%s2809_s3] sm:$0xf] }
  0x2c   :  { %543 = vmatpush1.bf16.msra.mxu1 %v2233_v22  ;;  %503 = vmatprep.subr.bf16.mxu0 %v2237_v23  ;;  %v2376_v57 = vrot.slane %v68_v54, %v2814_v51  ;;  %v73_v61 = vrot.slane %v68_v54, %v2815_v52  ;;  %v2385_v62 = vrot.slane %v68_v54, %v84_v53 }
  0x2d   :  { %544 = vmatprep.subr.bf16.mxu1 %v2240_v24  ;;  %248 = vmatprep.mubr.bf16.mxu1 %v2816_v0  ;;  %v77_v2 = vrot.slane %v68_v54, %v2813_v58 }
  0x2f   :  { %504 = vmatpush1.bf16.msra.mxu0 %v2242_v25 }
  0x30   :  { %545 = vmatpush1.bf16.msra.mxu1 %v2256_v28  ;;  %505 = vmatprep.subr.bf16.mxu0 %v2258_v29 }
  0x31   :  { %546 = vmatprep.subr.bf16.mxu1 %v2262_v30 }
  0x32   :  { %1704 = vmatmul.mubr.msk.bf16.gmra.mxu0 %vm110_vm0, %v62_v31  ;;  %1708 = vmatmul.mubr.msk.bf16.gmra.mxu1 %vm110_vm0, %v62_v31 }
  0x33   :  { %506 = vmatpush1.bf16.msra.mxu0 %v2265_v32  ;;  %185 = vmatprep.mubr.bf16.mxu0 %v2816_v0 }
  0x34   :  { %547 = vmatpush1.bf16.msra.mxu1 %v2267_v33  ;;  %507 = vmatprep.subr.bf16.mxu0 %v2271_v34 }
  0x35   :  { %548 = vmatprep.subr.bf16.mxu1 %v2274_v35  ;;  %258 = vmatprep.mubr.bf16.mxu1 %v2816_v0 }
  0x37   :  { %508 = vmatpush1.bf16.msra.mxu0 %v2278_v36 }
  0x38   :  { %549 = vmatpush1.bf16.msra.mxu1 %v2280_v37  ;;  %509 = vmatprep.subr.bf16.mxu0 %v2292_v40 }
  0x39   :  { %550 = vmatprep.subr.bf16.mxu1 %v2296_v41 }
  0x3a   :  { %1705 = vmatmul.mubr.msk.bf16.gmra.mxu0 %vm110_vm0, %v63_v43  ;;  %1709 = vmatmul.mubr.msk.bf16.gmra.mxu1 %vm110_vm0, %v63_v43 }
  0x3b   :  { %510 = vmatpush1.bf16.msra.mxu0 %v2298_v42  ;;  %529 = vmatprep.mubr.bf16.mxu0 %v2816_v0 }
  0x3c   :  { %551 = vmatpush1.bf16.msra.mxu1 %v2300_v44  ;;  %511 = vmatprep.subr.bf16.mxu0 %v2302_v45 }
  0x3d   :  { %552 = vmatprep.subr.bf16.mxu1 %v2305_v46  ;;  %570 = vmatprep.mubr.bf16.mxu1 %v2816_v0 }
  0x3f   :  { %512 = vmatpush1.bf16.msra.mxu0 %v2310_v47 }
  0x40   :  { %553 = vmatpush1.bf16.msra.mxu1 %v2314_v48  ;;  %613 = vmatprep.subr.bf16.mxu0 %v2194_v8 }
  0x41   :  { %654 = vmatprep.subr.bf16.mxu1 %v2196_v9 }
  0x42   :  { %530 = vmatmul.mubr.bf16.vlgmr.msra.gmra.mxu0 %v2816_v0 }
  0x43   :  { %571 = vmatmul.mubr.bf16.vlgmr.msra.gmra.mxu1 %v2816_v0  ;;  %614 = vmatpush1.bf16.msra.mxu0 %v2198_v10 }
  0x44   :  { %655 = vmatpush1.bf16.msra.mxu1 %v2200_v11  ;;  %615 = vmatprep.subr.bf16.mxu0 %v2203_v12 }
  0x45   :  { %656 = vmatprep.subr.bf16.mxu1 %v2207_v13  ;;  %645 = vmatprep.mubr.bf16.mxu0 %v2816_v0 }
  0x46   :  { %686 = vmatprep.mubr.bf16.mxu1 %v2816_v0 }
  0x47   :  { %616 = vmatpush1.bf16.msra.mxu0 %v2211_v14 }
  0x48   :  { %657 = vmatpush1.bf16.msra.mxu1 %v2213_v15  ;;  %617 = vmatprep.subr.bf16.mxu0 %v2225_v18 }
  0x49   :  { %658 = vmatprep.subr.bf16.mxu1 %v2228_v20 }
  0x4b   :  { %618 = vmatpush1.bf16.msra.mxu0 %v2230_v21 }
  0x4c   :  { %659 = vmatpush1.bf16.msra.mxu1 %v2233_v22  ;;  %619 = vmatprep.subr.bf16.mxu0 %v2237_v23 }
  0x4d   :  { %660 = vmatprep.subr.bf16.mxu1 %v2240_v24 }
  0x4f   :  { %620 = vmatpush1.bf16.msra.mxu0 %v2242_v25 }
  0x50   :  { %661 = vmatpush1.bf16.msra.mxu1 %v2256_v28  ;;  %621 = vmatprep.subr.bf16.mxu0 %v2258_v29 }
  0x51   :  { %662 = vmatprep.subr.bf16.mxu1 %v2262_v30 }
  0x53   :  { %622 = vmatpush1.bf16.msra.mxu0 %v2265_v32 }
  0x54   :  { %663 = vmatpush1.bf16.msra.mxu1 %v2267_v33  ;;  %623 = vmatprep.subr.bf16.mxu0 %v2271_v34 }
  0x55   :  { %664 = vmatprep.subr.bf16.mxu1 %v2274_v35 }
  0x57   :  { %624 = vmatpush1.bf16.msra.mxu0 %v2278_v36 }
  0x58   :  { %665 = vmatpush1.bf16.msra.mxu1 %v2280_v37  ;;  %625 = vmatprep.subr.bf16.mxu0 %v2292_v40 }
  0x59   :  { %666 = vmatprep.subr.bf16.mxu1 %v2296_v41 }
  0x5b   :  { %626 = vmatpush1.bf16.msra.mxu0 %v2298_v42 }
  0x5c   :  { %667 = vmatpush1.bf16.msra.mxu1 %v2300_v44  ;;  %627 = vmatprep.subr.bf16.mxu0 %v2302_v45 }
  0x5d   :  { %668 = vmatprep.subr.bf16.mxu1 %v2305_v46 }
  0x5f   :  { %628 = vmatpush1.bf16.msra.mxu0 %v2310_v47 }
  0x60   :  { %669 = vmatpush1.bf16.msra.mxu1 %v2314_v48  ;;  %729 = vmatprep.subr.bf16.mxu0 %v2194_v8 }
  0x61   :  { %770 = vmatprep.subr.bf16.mxu1 %v2196_v9 }
  0xe2   :  { %v2370_v55 = vpop.f32.mrf.mxu0  ;;  %v2372_v56 = vpop.f32.mrf.mxu1 }
  0xe4   :  { %v2379_v59 = vpop.f32.mrf.mxu0  ;;  %v2381_v60 = vpop.f32.mrf.mxu1 }
  0xe6   :  { %v161_v63 = vpop.f32.mrf.mxu0  ;;  %v234_v1 = vpop.f32.mrf.mxu1 }
  0xe7   :  { %v2389_v3 = vadd.f32 %v161_v63, %v73_v61  ;;  %v2392_v4 = vadd.f32 %v234_v1, %v2376_v57 }
  0xe8   :  { %v163_v5 = vpop.f32.mrf.mxu0  ;;  %v236_v6 = vpop.f32.mrf.mxu1 }
  0xe9   :  { %v2394_v7 = vadd.f32 %v163_v5, %v77_v2  ;;  %v2397_v16 = vadd.f32 %v236_v6, %v2385_v62 }
  0xea   :  { %v167_v17 = vpop.f32.mrf.mxu0  ;;  %v240_v19 = vpop.f32.mrf.mxu1 }
  0xeb   :  { %v2399_v26 = vadd.f32 %v167_v17, %v73_v61  ;;  %v2402_v27 = vadd.f32 %v240_v19, %v2376_v57 }
  0xec   :  { %v169_v31 = vpop.f32.mrf.mxu0  ;;  %v242_v38 = vpop.f32.mrf.mxu1 }
  0xed   :  { %2821 = vst [vmem:[#allocation10_spill] sm:$0xff] %v2402_v27  ;;  %v2404_v39 = vadd.f32 %v169_v31, %v77_v2  ;;  %v2407_v43 = vadd.f32 %v242_v38, %v2385_v62 }
  0xee   :  { %v171_v49 = vpop.f32.mrf.mxu0  ;;  %v244_v53 = vpop.f32.mrf.mxu1 }
  0xef   :  { %v2409_v54 = vadd.f32 %v171_v49, %v73_v61  ;;  %v2412_v63 = vadd.f32 %v244_v53, %v2376_v57 }
  0xf0   :  { %v173_v1 = vpop.f32.mrf.mxu0  ;;  %v246_v5 = vpop.f32.mrf.mxu1 }
  0xf1   :  { %2822 = vst [vmem:[#allocation11_spill] sm:$0xff] %v2409_v54  ;;  %2823 = vst [vmem:[#allocation12_spill] sm:$0xff] %v2412_v63  ;;  %v2414_v6 = vadd.f32 %v173_v1, %v77_v2  ;;  %v2417_v17 = vadd.f32 %v246_v5, %v2385_v62 }
  0xf2   :  { %v177_v19 = vpop.f32.mrf.mxu0  ;;  %v250_v31 = vpop.f32.mrf.mxu1 }
  0xf3   :  { %2824 = vst [vmem:[#allocation13_spill] sm:$0xff] %v2414_v6  ;;  %2825 = vst [vmem:[#allocation14_spill] sm:$0xff] %v2417_v17  ;;  %v2419_v58 = vadd.f32 %v177_v19, %v73_v61  ;;  %v2422_v38 = vadd.f32 %v250_v31, %v2376_v57 }
  0xf4   :  { %v179_v51 = vpop.f32.mrf.mxu0  ;;  %v252_v49 = vpop.f32.mrf.mxu1 }
  0xf5   :  { %2826 = vst [vmem:[#allocation15_spill] sm:$0xff] %v2419_v58  ;;  %2827 = vst [vmem:[#allocation16_spill] sm:$0xff] %v2422_v38  ;;  %v2424_v52 = vadd.f32 %v179_v51, %v77_v2  ;;  %v2427_v53 = vadd.f32 %v252_v49, %v2385_v62 }
  0xf6   :  { %v181_v0 = vpop.f32.mrf.mxu0  ;;  %v254_v1 = vpop.f32.mrf.mxu1 }
  0xf7   :  { %2828 = vst [vmem:[#allocation17_spill] sm:$0xff] %v2424_v52  ;;  %2829 = vst [vmem:[#allocation18_spill] sm:$0xff] %v2427_v53  ;;  %v2429_v50 = vadd.f32 %v181_v0, %v73_v61  ;;  %v2432_v5 = vadd.f32 %v254_v1, %v2376_v57 }
  0xf8   :  { %v183_v63 = vpop.f32.mrf.mxu0  ;;  %v256_v19 = vpop.f32.mrf.mxu1 }
  0xf9   :  { %2830 = vst [vmem:[#allocation19_spill] sm:$0xff] %v2429_v50  ;;  %2831 = vst [vmem:[#allocation20_spill] sm:$0xff] %v2432_v5  ;;  %v2434_v58 = vadd.f32 %v183_v63, %v77_v2  ;;  %v2437_v31 = vadd.f32 %v256_v19, %v2385_v62 }
  0xfa   :  { %v187_v38 = vpop.f32.mrf.mxu0  ;;  %v260_v51 = vpop.f32.mrf.mxu1 }
  0xfb   :  { %2832 = vst [vmem:[#allocation21_spill] sm:$0xff] %v2434_v58  ;;  %2833 = vst [vmem:[#allocation22_spill] sm:$0xff] %v2437_v31  ;;  %v2439_v52 = vadd.f32 %v187_v38, %v73_v61  ;;  %v2442_v49 = vadd.f32 %v260_v51, %v2376_v57 }
  0xfc   :  { %v189_v53 = vpop.f32.mrf.mxu0  ;;  %v262_v0 = vpop.f32.mrf.mxu1 }
  0xfd   :  { %2834 = vst [vmem:[#allocation23_spill] sm:$0xff] %v2439_v52  ;;  %2835 = vst [vmem:[#allocation24_spill] sm:$0xff] %v2442_v49  ;;  %v2444_v50 = vadd.f32 %v189_v53, %v77_v2  ;;  %v2447_v1 = vadd.f32 %v262_v0, %v2385_v62  ;;  %v158_v52 = vadd.f32 %v2370_v55, %v73_v61 }
  0xfe   :  { %v191_v5 = vpop.f32.mrf.mxu0  ;;  %v264_v63 = vpop.f32.mrf.mxu1  ;;  %v160_v0 = vadd.f32 %v2379_v59, %v77_v2  ;;  %v231_v59 = vadd.f32 %v2372_v56, %v2376_v57 }
  0xff   :  { %2836 = vst [vmem:[#allocation25_spill] sm:$0xff] %v2444_v50  ;;  %2837 = vst [vmem:[#allocation26_spill] sm:$0xff] %v2447_v1  ;;  %v2449_v58 = vadd.f32 %v191_v5, %v73_v61  ;;  %v2452_v19 = vadd.f32 %v264_v63, %v2376_v57  ;;  %v233_v61 = vadd.f32 %v2381_v60, %v2385_v62 }
 0x100   :  { %v193_v31 = vpop.f32.mrf.mxu0  ;;  %v266_v38 = vpop.f32.mrf.mxu1 }
 0x101   :  { %2838 = vst [vmem:[#allocation27_spill] sm:$0xff] %v2449_v58  ;;  %2839 = vst [vmem:[#allocation28_spill] sm:$0xff] %v2452_v19  ;;  %v2455_v51 = vadd.f32 %v193_v31, %v77_v2  ;;  %v2458_v49 = vadd.f32 %v266_v38, %v2385_v62 }
 0x102   :  { %v531_v53 = vpop.f32.mrf.mxu0 }
 0x103   :  { %v579_v1 = vadd.f32 %v531_v53, %v158_v52  ;;  %v572_v50 = vpop.f32.mrf.mxu1 }
 0x104   :  { %v533_v17 = vpop.f32.mrf.mxu0  ;;  %v581_v38 = vadd.f32 %v572_v50, %v231_v59 }
 0x105   :  { %v1742_v5 = vmul.f32 -1.442695, %v579_v1  ;;  %v580_v58 = vadd.f32 %v533_v17, %v160_v0  ;;  %v574_v6 = vpop.f32.mrf.mxu1 }
 0x106   :  { %v535_v63 = vpop.f32.mrf.mxu0  ;;  %v582_v31 = vadd.f32 %v574_v6, %v233_v61 }
 0x107   :  { %1914 = vpow2.f32 %v1742_v5  ;;  %v1743_v19 = vmul.f32 -1.442695, %v580_v58  ;;  %v576_v54 = vpop.f32.mrf.mxu1  ;;  %v2840_v63 = vmov 0  }
 0x108   :  { %v536_v27 = vpop.f32.mrf.mxu0  ;;  %v1744_v52 = vmul.f32 -1.442695, %v582_v31 }
 0x109   :  { %1916 = vpow2.f32 %v1743_v19  ;;  %v577_v55 = vpop.f32.mrf.mxu1 }
 0x10a   :  { %1918 = vpow2.f32 %v1744_v52 }
 0x114   :  { %v1915_v2 = vpop.eup %1914 }
 0x115   :  { %v586_v1 = vadd.f32 1.0, %v1915_v2 }
 0x116   :  { %v1917_v17 = vpop.eup %1916 }
 0x117   :  { %1920 = vrcp.f32 %v586_v1  ;;  %v592_v53 = vadd.f32 1.0, %v1917_v17  ;;  %v1919_v58 = vpop.eup %1918 }
 0x118   :  { %1922 = vtanh.f32 %v581_v38  ;;  %v599_v0 = vadd.f32 1.0, %v1919_v58 }
 0x119   :  { %1924 = vrcp.f32 %v592_v53 }
 0x11a   :  { %1926 = vrcp.f32 %v599_v0 }
 0x124   :  { %v1921_v27 = vpop.eup %1920 }
 0x125   :  { %v1923_v54 = vpop.eup %1922 }
 0x126   :  { %v1925_v19 = vpop.eup %1924  ;;  %v603_v62 = vmul.f32 %v1923_v54, %v1921_v27 }
 0x127   :  { %v602_v60 = vmul.f32 0.0, %v1925_v19  ;;  %v1927_v50 = vpop.eup %1926 }
 0x129   :  { %v2465_v6 = vadd.f32 %v603_v62, %v602_v60 }
 0x12b   :  { %1928 = vtanh.f32 %v2465_v6 }
 0x138   :  { %v1929_v56 = vpop.eup %1928 }
 0x139   :  { %v606_v57 = vmul.f32 %v1929_v56, %v1927_v50 }
 0x13b   :  { %v612_v5 = vpack.c.bf16 %v606_v57, %v606_v57 }
 0x13d   :  { %646 = vmatmul.mubr.bf16.vlgmr.msra.gmra.mxu0 %v612_v5  ;;  %687 = vmatmul.mubr.bf16.vlgmr.msra.gmra.mxu1 %v612_v5 }
 0x13e   :  { %730 = vmatpush1.bf16.msra.mxu0 %v2198_v10  ;;  %771 = vmatpush1.bf16.msra.mxu1 %v2200_v11 }
 0x13f   :  { %731 = vmatprep.subr.bf16.mxu0 %v2203_v12  ;;  %772 = vmatprep.subr.bf16.mxu1 %v2207_v13 }
 0x140   :  { %761 = vmatprep.mubr.bf16.mxu0 %v2840_v63  ;;  %802 = vmatprep.mubr.bf16.mxu1 %v2840_v63 }
 0x142   :  { %732 = vmatpush1.bf16.msra.mxu0 %v2211_v14  ;;  %773 = vmatpush1.bf16.msra.mxu1 %v2213_v15 }
 0x143   :  { %733 = vmatprep.subr.bf16.mxu0 %v2225_v18  ;;  %774 = vmatprep.subr.bf16.mxu1 %v2228_v20 }
 0x146   :  { %734 = vmatpush1.bf16.msra.mxu0 %v2230_v21  ;;  %775 = vmatpush1.bf16.msra.mxu1 %v2233_v22 }
 0x147   :  { %735 = vmatprep.subr.bf16.mxu0 %v2237_v23  ;;  %776 = vmatprep.subr.bf16.mxu1 %v2240_v24 }
 0x14a   :  { %736 = vmatpush1.bf16.msra.mxu0 %v2242_v25  ;;  %777 = vmatpush1.bf16.msra.mxu1 %v2256_v28 }
 0x14b   :  { %737 = vmatprep.subr.bf16.mxu0 %v2258_v29  ;;  %778 = vmatprep.subr.bf16.mxu1 %v2262_v30 }
 0x14e   :  { %738 = vmatpush1.bf16.msra.mxu0 %v2265_v32  ;;  %779 = vmatpush1.bf16.msra.mxu1 %v2267_v33 }
 0x14f   :  { %739 = vmatprep.subr.bf16.mxu0 %v2271_v34  ;;  %780 = vmatprep.subr.bf16.mxu1 %v2274_v35 }
 0x152   :  { %740 = vmatpush1.bf16.msra.mxu0 %v2278_v36  ;;  %781 = vmatpush1.bf16.msra.mxu1 %v2280_v37 }
 0x153   :  { %741 = vmatprep.subr.bf16.mxu0 %v2292_v40  ;;  %782 = vmatprep.subr.bf16.mxu1 %v2296_v41 }
 0x156   :  { %742 = vmatpush1.bf16.msra.mxu0 %v2298_v42  ;;  %783 = vmatpush1.bf16.msra.mxu1 %v2300_v44 }
 0x157   :  { %743 = vmatprep.subr.bf16.mxu0 %v2302_v45  ;;  %784 = vmatprep.subr.bf16.mxu1 %v2305_v46 }
 0x15a   :  { %744 = vmatpush1.bf16.msra.mxu0 %v2310_v47  ;;  %785 = vmatpush1.bf16.msra.mxu1 %v2314_v48 }
 0x15b   :  { %845 = vmatprep.subr.bf16.mxu0 %v2194_v8  ;;  %886 = vmatprep.subr.bf16.mxu1 %v2196_v9 }
 0x1fd   :  { %v647_v55 = vpop.f32.mrf.mxu0  ;;  %v688_v61 = vpop.f32.mrf.mxu1 }
 0x1fe   :  { %v695_v31 = vadd.f32 %v647_v55, %v2389_v3  ;;  %v697_v19 = vadd.f32 %v688_v61, %v2392_v4 }
 0x1ff   :  { %v649_v59 = vpop.f32.mrf.mxu0  ;;  %v690_v52 = vpop.f32.mrf.mxu1 }
 0x200   :  { %v1745_v2 = vmul.f32 -1.442695, %v695_v31  ;;  %v696_v38 = vadd.f32 %v649_v59, %v2394_v7  ;;  %v698_v54 = vadd.f32 %v690_v52, %v2397_v16 }
 0x201   :  { %v651_v1 = vpop.f32.mrf.mxu0  ;;  %v692_v17 = vpop.f32.mrf.mxu1 }
 0x202   :  { %1930 = vpow2.f32 %v1745_v2  ;;  %v1746_v53 = vmul.f32 -1.442695, %v696_v38  ;;  %v1747_v0 = vmul.f32 -1.442695, %v698_v54 }
 0x203   :  { %v652_v58 = vpop.f32.mrf.mxu0  ;;  %v693_v27 = vpop.f32.mrf.mxu1 }
 0x204   :  { %1932 = vpow2.f32 %v1746_v53 }
 0x205   :  { %1934 = vtanh.f32 %v697_v19 }
 0x206   :  { %1936 = vpow2.f32 %v1747_v0 }
 0x20f   :  { %v1931_v60 = vpop.eup %1930 }
 0x210   :  { %v702_v62 = vadd.f32 1.0, %v1931_v60 }
 0x211   :  { %v1933_v3 = vpop.eup %1932 }
 0x212   :  { %1938 = vrcp.f32 %v702_v62  ;;  %v708_v50 = vadd.f32 1.0, %v1933_v3  ;;  %v1935_v7 = vpop.eup %1934 }
 0x213   :  { %v1937_v56 = vpop.eup %1936 }
 0x214   :  { %1940 = vrcp.f32 %v708_v50  ;;  %v715_v31 = vadd.f32 1.0, %v1937_v56  ;;  %v2841_v50 = vld [vmem:[#allocation10_spill] sm:$0xff] }
 0x216   :  { %1942 = vrcp.f32 %v715_v31 }
 0x21f   :  { %v1939_v57 = vpop.eup %1938 }
 0x220   :  { %v719_v5 = vmul.f32 %v1939_v57, %v1935_v7 }
 0x221   :  { %v1941_v55 = vpop.eup %1940 }
 0x222   :  { %v718_v59 = vmul.f32 %v1941_v55, %v2465_v6 }
 0x223   :  { %v1943_v4 = vpop.eup %1942 }
 0x224   :  { %v2507_v16 = vadd.f32 %v719_v5, %v718_v59 }
 0x226   :  { %1944 = vtanh.f32 %v2507_v16 }
 0x233   :  { %v1945_v61 = vpop.eup %1944 }
 0x234   :  { %v722_v52 = vmul.f32 %v1945_v61, %v1943_v4 }
 0x236   :  { %v728_v2 = vpack.c.bf16 %v722_v52, %v722_v52 }
 0x238   :  { %762 = vmatmul.mubr.bf16.vlgmr.msra.gmra.mxu0 %v728_v2  ;;  %803 = vmatmul.mubr.bf16.vlgmr.msra.gmra.mxu1 %v728_v2 }
 0x239   :  { %846 = vmatpush1.bf16.msra.mxu0 %v2198_v10  ;;  %887 = vmatpush1.bf16.msra.mxu1 %v2200_v11 }
 0x23a   :  { %847 = vmatprep.subr.bf16.mxu0 %v2203_v12  ;;  %888 = vmatprep.subr.bf16.mxu1 %v2207_v13 }
 0x23b   :  { %877 = vmatprep.mubr.bf16.mxu0 %v2840_v63  ;;  %918 = vmatprep.mubr.bf16.mxu1 %v2840_v63 }
 0x23d   :  { %848 = vmatpush1.bf16.msra.mxu0 %v2211_v14  ;;  %889 = vmatpush1.bf16.msra.mxu1 %v2213_v15 }
 0x23e   :  { %849 = vmatprep.subr.bf16.mxu0 %v2225_v18  ;;  %890 = vmatprep.subr.bf16.mxu1 %v2228_v20 }
 0x241   :  { %850 = vmatpush1.bf16.msra.mxu0 %v2230_v21  ;;  %891 = vmatpush1.bf16.msra.mxu1 %v2233_v22 }
 0x242   :  { %851 = vmatprep.subr.bf16.mxu0 %v2237_v23  ;;  %892 = vmatprep.subr.bf16.mxu1 %v2240_v24 }
 0x245   :  { %852 = vmatpush1.bf16.msra.mxu0 %v2242_v25  ;;  %893 = vmatpush1.bf16.msra.mxu1 %v2256_v28 }
 0x246   :  { %853 = vmatprep.subr.bf16.mxu0 %v2258_v29  ;;  %894 = vmatprep.subr.bf16.mxu1 %v2262_v30 }
 0x249   :  { %854 = vmatpush1.bf16.msra.mxu0 %v2265_v32  ;;  %895 = vmatpush1.bf16.msra.mxu1 %v2267_v33 }
 0x24a   :  { %855 = vmatprep.subr.bf16.mxu0 %v2271_v34  ;;  %896 = vmatprep.subr.bf16.mxu1 %v2274_v35 }
 0x24d   :  { %856 = vmatpush1.bf16.msra.mxu0 %v2278_v36  ;;  %897 = vmatpush1.bf16.msra.mxu1 %v2280_v37 }
 0x24e   :  { %857 = vmatprep.subr.bf16.mxu0 %v2292_v40  ;;  %898 = vmatprep.subr.bf16.mxu1 %v2296_v41 }
 0x251   :  { %858 = vmatpush1.bf16.msra.mxu0 %v2298_v42  ;;  %899 = vmatpush1.bf16.msra.mxu1 %v2300_v44 }
 0x252   :  { %859 = vmatprep.subr.bf16.mxu0 %v2302_v45  ;;  %900 = vmatprep.subr.bf16.mxu1 %v2305_v46 }
 0x255   :  { %860 = vmatpush1.bf16.msra.mxu0 %v2310_v47  ;;  %901 = vmatpush1.bf16.msra.mxu1 %v2314_v48 }
 0x256   :  { %961 = vmatprep.subr.bf16.mxu0 %v2194_v8  ;;  %1002 = vmatprep.subr.bf16.mxu1 %v2196_v9 }
 0x2f8   :  { %v763_v6 = vpop.f32.mrf.mxu0  ;;  %v804_v38 = vpop.f32.mrf.mxu1 }
 0x2f9   :  { %v811_v1 = vadd.f32 %v763_v6, %v2399_v26  ;;  %v813_v7 = vadd.f32 %v804_v38, %v2841_v50 }
 0x2fa   :  { %v765_v17 = vpop.f32.mrf.mxu0  ;;  %v806_v53 = vpop.f32.mrf.mxu1 }
 0x2fb   :  { %v1748_v58 = vmul.f32 -1.442695, %v811_v1  ;;  %v812_v27 = vadd.f32 %v765_v17, %v2404_v39  ;;  %v814_v3 = vadd.f32 %v806_v53, %v2407_v43  ;;  %v2843_v53 = vld [vmem:[#allocation13_spill] sm:$0xff] }
 0x2fc   :  { %v767_v54 = vpop.f32.mrf.mxu0  ;;  %v808_v19 = vpop.f32.mrf.mxu1 }
 0x2fd   :  { %1946 = vpow2.f32 %v1748_v58  ;;  %v1749_v0 = vmul.f32 -1.442695, %v812_v27  ;;  %v1750_v56 = vmul.f32 -1.442695, %v814_v3  ;;  %v2845_v3 = vld [vmem:[#allocation12_spill] sm:$0xff] }
 0x2fe   :  { %v768_v60 = vpop.f32.mrf.mxu0  ;;  %v809_v62 = vpop.f32.mrf.mxu1 }
 0x2ff   :  { %1948 = vpow2.f32 %v1749_v0  ;;  %v2844_v62 = vld [vmem:[#allocation14_spill] sm:$0xff] }
 0x300   :  { %1950 = vtanh.f32 %v813_v7 }
 0x301   :  { %1952 = vpow2.f32 %v1750_v56 }
 0x30a   :  { %v1947_v57 = vpop.eup %1946 }
 0x30b   :  { %v818_v5 = vadd.f32 1.0, %v1947_v57 }
 0x30c   :  { %v1949_v26 = vpop.eup %1948 }
 0x30d   :  { %1954 = vrcp.f32 %v818_v5  ;;  %v824_v55 = vadd.f32 1.0, %v1949_v26  ;;  %v1951_v39 = vpop.eup %1950 }
 0x30e   :  { %v1953_v31 = vpop.eup %1952 }
 0x30f   :  { %1956 = vrcp.f32 %v824_v55  ;;  %v831_v52 = vadd.f32 1.0, %v1953_v31 }
 0x311   :  { %1958 = vrcp.f32 %v831_v52 }
 0x31a   :  { %v1955_v59 = vpop.eup %1954 }
 0x31b   :  { %v835_v4 = vmul.f32 %v1955_v59, %v1951_v39 }
 0x31c   :  { %v1957_v61 = vpop.eup %1956 }
 0x31d   :  { %v834_v2 = vmul.f32 %v1957_v61, %v2507_v16 }
 0x31e   :  { %v1959_v6 = vpop.eup %1958 }
 0x31f   :  { %v2549_v43 = vadd.f32 %v835_v4, %v834_v2 }
 0x321   :  { %1960 = vtanh.f32 %v2549_v43 }
 0x32e   :  { %v1961_v38 = vpop.eup %1960 }
 0x32f   :  { %v838_v1 = vmul.f32 %v1961_v38, %v1959_v6 }
 0x331   :  { %v844_v17 = vpack.c.bf16 %v838_v1, %v838_v1 }
 0x333   :  { %878 = vmatmul.mubr.bf16.vlgmr.msra.gmra.mxu0 %v844_v17  ;;  %919 = vmatmul.mubr.bf16.vlgmr.msra.gmra.mxu1 %v844_v17  ;;  %v2594_v17 = vld [vmem:[#allocation3 + $0xe0] ss:$16 sps:$4 sm:$0xff]  }
 0x334   :  { %962 = vmatpush1.bf16.msra.mxu0 %v2198_v10  ;;  %1003 = vmatpush1.bf16.msra.mxu1 %v2200_v11 }
 0x335   :  { %963 = vmatprep.subr.bf16.mxu0 %v2203_v12  ;;  %1004 = vmatprep.subr.bf16.mxu1 %v2207_v13  ;;  %v2842_v12 = vld [vmem:[#allocation11_spill] sm:$0xff] }
 0x336   :  { %993 = vmatprep.mubr.bf16.mxu0 %v2840_v63  ;;  %1034 = vmatprep.mubr.bf16.mxu1 %v2840_v63 }
 0x338   :  { %964 = vmatpush1.bf16.msra.mxu0 %v2211_v14  ;;  %1005 = vmatpush1.bf16.msra.mxu1 %v2213_v15 }
 0x339   :  { %965 = vmatprep.subr.bf16.mxu0 %v2225_v18  ;;  %1006 = vmatprep.subr.bf16.mxu1 %v2228_v20 }
 0x33c   :  { %966 = vmatpush1.bf16.msra.mxu0 %v2230_v21  ;;  %1007 = vmatpush1.bf16.msra.mxu1 %v2233_v22 }
 0x33d   :  { %967 = vmatprep.subr.bf16.mxu0 %v2237_v23  ;;  %1008 = vmatprep.subr.bf16.mxu1 %v2240_v24 }
 0x340   :  { %968 = vmatpush1.bf16.msra.mxu0 %v2242_v25  ;;  %1009 = vmatpush1.bf16.msra.mxu1 %v2256_v28 }
 0x341   :  { %969 = vmatprep.subr.bf16.mxu0 %v2258_v29  ;;  %1010 = vmatprep.subr.bf16.mxu1 %v2262_v30 }
 0x344   :  { %970 = vmatpush1.bf16.msra.mxu0 %v2265_v32  ;;  %1011 = vmatpush1.bf16.msra.mxu1 %v2267_v33 }
 0x345   :  { %971 = vmatprep.subr.bf16.mxu0 %v2271_v34  ;;  %1012 = vmatprep.subr.bf16.mxu1 %v2274_v35 }
 0x348   :  { %972 = vmatpush1.bf16.msra.mxu0 %v2278_v36  ;;  %1013 = vmatpush1.bf16.msra.mxu1 %v2280_v37 }
 0x349   :  { %973 = vmatprep.subr.bf16.mxu0 %v2292_v40  ;;  %1014 = vmatprep.subr.bf16.mxu1 %v2296_v41 }
 0x34c   :  { %974 = vmatpush1.bf16.msra.mxu0 %v2298_v42  ;;  %1015 = vmatpush1.bf16.msra.mxu1 %v2300_v44 }
 0x34d   :  { %975 = vmatprep.subr.bf16.mxu0 %v2302_v45  ;;  %1016 = vmatprep.subr.bf16.mxu1 %v2305_v46 }
 0x350   :  { %976 = vmatpush1.bf16.msra.mxu0 %v2310_v47  ;;  %1017 = vmatpush1.bf16.msra.mxu1 %v2314_v48 }
 0x351   :  { %1077 = vmatprep.subr.bf16.mxu0 %v2194_v8  ;;  %1118 = vmatprep.subr.bf16.mxu1 %v2196_v9 }
 0x3f3   :  { %v879_v10 = vpop.f32.mrf.mxu0  ;;  %v920_v11 = vpop.f32.mrf.mxu1 }
 0x3f4   :  { %v927_v13 = vadd.f32 %v879_v10, %v2842_v12  ;;  %v929_v9 = vadd.f32 %v920_v11, %v2845_v3  ;;  %v2597_v10 = vld [vmem:[#allocation3 + $0xe8] ss:$16 sps:$4 sm:$0xff]   ;;  %v2603_v11 = vld [vmem:[#allocation3 + $0xcc] ss:$16 sps:$4 sm:$0xff]   ;;  %v2608_v12 = vld [vmem:[#allocation3 + $0xc0] ss:$16 sps:$4 sm:$0xff]  }
 0x3f5   :  { %v881_v14 = vpop.f32.mrf.mxu0  ;;  %v922_v15 = vpop.f32.mrf.mxu1 }
 0x3f6   :  { %v1751_v16 = vmul.f32 -1.442695, %v927_v13  ;;  %v928_v58 = vadd.f32 %v881_v14, %v2843_v53  ;;  %v930_v8 = vadd.f32 %v922_v15, %v2844_v62  ;;  %v2611_v13 = vld [vmem:[#allocation3 + $0xc8] ss:$16 sps:$4 sm:$0xff]  }
 0x3f7   :  { %v883_v27 = vpop.f32.mrf.mxu0  ;;  %v924_v54 = vpop.f32.mrf.mxu1 }
 0x3f8   :  { %1962 = vpow2.f32 %v1751_v16  ;;  %v1752_v19 = vmul.f32 -1.442695, %v928_v58  ;;  %v1753_v50 = vmul.f32 -1.442695, %v930_v8 }
 0x3f9   :  { %v884_v0 = vpop.f32.mrf.mxu0  ;;  %v925_v60 = vpop.f32.mrf.mxu1 }
 0x3fa   :  { %1964 = vpow2.f32 %v1752_v19 }
 0x3fb   :  { %1966 = vtanh.f32 %v929_v9  ;;  %v2660_v9 = vld [vmem:[#allocation3 + $0xa4] ss:$16 sps:$4 sm:$0xff]  }
 0x3fc   :  { %1968 = vpow2.f32 %v1753_v50  ;;  %v2663_v50 = vld [vmem:[#allocation3 + $0xac] ss:$16 sps:$4 sm:$0xff]  }
 0x405   :  { %v1963_v7 = vpop.eup %1962 }
 0x406   :  { %v934_v56 = vadd.f32 1.0, %v1963_v7  ;;  %v2666_v7 = vld [vmem:[#allocation3 + $0xa0] ss:$16 sps:$4 sm:$0xff]  }
 0x407   :  { %v1965_v57 = vpop.eup %1964 }
 0x408   :  { %1970 = vrcp.f32 %v934_v56  ;;  %v940_v5 = vadd.f32 1.0, %v1965_v57  ;;  %v1967_v26 = vpop.eup %1966  ;;  %v2669_v56 = vld [vmem:[#allocation3 + $0xa8] ss:$16 sps:$4 sm:$0xff]   ;;  %v2672_v57 = vld [vmem:[#allocation3 + $0x84] ss:$16 sps:$4 sm:$0xff]  }
 0x409   :  { %v1969_v55 = vpop.eup %1968 }
 0x40a   :  { %1972 = vrcp.f32 %v940_v5  ;;  %v947_v4 = vadd.f32 1.0, %v1969_v55  ;;  %v2675_v5 = vld [vmem:[#allocation3 + $0x8c] ss:$16 sps:$4 sm:$0xff]   ;;  %v2681_v55 = vld [vmem:[#allocation3 + $0x88] ss:$16 sps:$4 sm:$0xff]  }
 0x40c   :  { %1974 = vrcp.f32 %v947_v4  ;;  %v2693_v4 = vld [vmem:[#allocation3 + $0x68] ss:$16 sps:$4 sm:$0xff]  }
 0x415   :  { %v1971_v39 = vpop.eup %1970 }
 0x416   :  { %v951_v31 = vmul.f32 %v1971_v39, %v1967_v26  ;;  %v2678_v26 = vld [vmem:[#allocation3 + $0x80] ss:$16 sps:$4 sm:$0xff]   ;;  %v2684_v39 = vld [vmem:[#allocation3 + $0x64] ss:$16 sps:$4 sm:$0xff]  }
 0x417   :  { %v1973_v59 = vpop.eup %1972 }
 0x418   :  { %v950_v61 = vmul.f32 %v1973_v59, %v2549_v43  ;;  %v2600_v43 = vld [vmem:[#allocation3 + $0xc4] ss:$16 sps:$4 sm:$0xff]   ;;  %v2690_v59 = vld [vmem:[#allocation3 + $0x60] ss:$16 sps:$4 sm:$0xff]  }
 0x419   :  { %v1975_v2 = vpop.eup %1974 }
 0x41a   :  { %v2591_v52 = vadd.f32 %v951_v31, %v950_v61  ;;  %v2687_v31 = vld [vmem:[#allocation3 + $0x6c] ss:$16 sps:$4 sm:$0xff]   ;;  %v2696_v61 = vld [vmem:[#allocation3 + $0x44] ss:$16 sps:$4 sm:$0xff]  }
 0x41c   :  { %1976 = vtanh.f32 %v2591_v52 }
 0x429   :  { %v1977_v6 = vpop.eup %1976 }
 0x42a   :  { %v954_v38 = vmul.f32 %v1977_v6, %v1975_v2  ;;  %v2702_v2 = vld [vmem:[#allocation3 + $0x40] ss:$16 sps:$4 sm:$0xff]   ;;  %v2705_v6 = vld [vmem:[#allocation3 + $0x48] ss:$16 sps:$4 sm:$0xff]  }
 0x42c   :  { %v960_v1 = vpack.c.bf16 %v954_v38, %v954_v38  ;;  %v2708_v38 = vld [vmem:[#allocation3 + $0x24] ss:$16 sps:$4 sm:$0xff]  }
 0x42e   :  { %994 = vmatmul.mubr.bf16.vlgmr.msra.gmra.mxu0 %v960_v1  ;;  %1035 = vmatmul.mubr.bf16.vlgmr.msra.gmra.mxu1 %v960_v1  ;;  %v2711_v1 = vld [vmem:[#allocation3 + $0x2c] ss:$16 sps:$4 sm:$0xff]  }
 0x42f   :  { %1078 = vmatpush1.bf16.msra.mxu0 %v2594_v17  ;;  %1119 = vmatpush1.bf16.msra.mxu1 %v2597_v10 }
 0x430   :  { %1079 = vmatprep.subr.bf16.mxu0 %v2600_v43  ;;  %1120 = vmatprep.subr.bf16.mxu1 %v2603_v11 }
 0x431   :  { %1109 = vmatprep.mubr.bf16.mxu0 %v2840_v63  ;;  %1150 = vmatprep.mubr.bf16.mxu1 %v2840_v63 }
 0x433   :  { %1080 = vmatpush1.bf16.msra.mxu0 %v2608_v12  ;;  %1121 = vmatpush1.bf16.msra.mxu1 %v2611_v13 }
 0x434   :  { %1081 = vmatprep.subr.bf16.mxu0 %v2225_v18  ;;  %1122 = vmatprep.subr.bf16.mxu1 %v2228_v20  ;;  %v2638_v18 = vld [vmem:[#allocation3 + $0xe4] ss:$16 sps:$4 sm:$0xff]   ;;  %v2641_v20 = vld [vmem:[#allocation3 + $0xec] ss:$16 sps:$4 sm:$0xff]  }
 0x437   :  { %1082 = vmatpush1.bf16.msra.mxu0 %v2230_v21  ;;  %1123 = vmatpush1.bf16.msra.mxu1 %v2233_v22 }
 0x438   :  { %1083 = vmatprep.subr.bf16.mxu0 %v2237_v23  ;;  %1124 = vmatprep.subr.bf16.mxu1 %v2240_v24  ;;  %v2846_v23 = vld [vmem:[#allocation15_spill] sm:$0xff] }
 0x43b   :  { %1084 = vmatpush1.bf16.msra.mxu0 %v2242_v25  ;;  %1125 = vmatpush1.bf16.msra.mxu1 %v2256_v28 }
 0x43c   :  { %1085 = vmatprep.subr.bf16.mxu0 %v2258_v29  ;;  %1126 = vmatprep.subr.bf16.mxu1 %v2262_v30  ;;  %v2847_v30 = vld [vmem:[#allocation17_spill] sm:$0xff] }
 0x43f   :  { %1086 = vmatpush1.bf16.msra.mxu0 %v2265_v32  ;;  %1127 = vmatpush1.bf16.msra.mxu1 %v2267_v33 }
 0x440   :  { %1087 = vmatprep.subr.bf16.mxu0 %v2271_v34  ;;  %1128 = vmatprep.subr.bf16.mxu1 %v2274_v35 }
 0x443   :  { %1088 = vmatpush1.bf16.msra.mxu0 %v2278_v36  ;;  %1129 = vmatpush1.bf16.msra.mxu1 %v2280_v37 }
 0x444   :  { %1089 = vmatprep.subr.bf16.mxu0 %v2292_v40  ;;  %1130 = vmatprep.subr.bf16.mxu1 %v2296_v41  ;;  %v2848_v40 = vld [vmem:[#allocation18_spill] sm:$0xff] }
 0x447   :  { %1090 = vmatpush1.bf16.msra.mxu0 %v2298_v42  ;;  %1131 = vmatpush1.bf16.msra.mxu1 %v2300_v44  ;;  %v2849_v42 = vld [vmem:[#allocation16_spill] sm:$0xff] }
 0x448   :  { %1091 = vmatprep.subr.bf16.mxu0 %v2302_v45  ;;  %1132 = vmatprep.subr.bf16.mxu1 %v2305_v46 }
 0x44b   :  { %1092 = vmatpush1.bf16.msra.mxu0 %v2310_v47  ;;  %1133 = vmatpush1.bf16.msra.mxu1 %v2314_v48 }
 0x44c   :  { %1193 = vmatprep.subr.bf16.mxu0 %v2638_v18  ;;  %1234 = vmatprep.subr.bf16.mxu1 %v2641_v20 }
 0x4ee   :  { %v995_v21 = vpop.f32.mrf.mxu0  ;;  %v1036_v22 = vpop.f32.mrf.mxu1 }
 0x4ef   :  { %v1043_v24 = vadd.f32 %v995_v21, %v2846_v23  ;;  %v1045_v44 = vadd.f32 %v1036_v22, %v2849_v42  ;;  %v2714_v21 = vld [vmem:[#allocation3 + $0x20] ss:$16 sps:$4 sm:$0xff]   ;;  %v2717_v22 = vld [vmem:[#allocation3 + $0x28] ss:$16 sps:$4 sm:$0xff]   ;;  %v2720_v23 = vld [vmem:[#allocation3 + $0x4] ss:$16 sps:$4 sm:$0xff]  }
 0x4f0   :  { %v997_v25 = vpop.f32.mrf.mxu0  ;;  %v1038_v28 = vpop.f32.mrf.mxu1 }
 0x4f1   :  { %v1754_v29 = vmul.f32 -1.442695, %v1043_v24  ;;  %v1044_v32 = vadd.f32 %v997_v25, %v2847_v30  ;;  %v1046_v41 = vadd.f32 %v1038_v28, %v2848_v40  ;;  %v2723_v24 = vld [vmem:[#allocation3 + $0xc] ss:$16 sps:$4 sm:$0xff]   ;;  %v2726_v25 = vld [vmem:[#allocation3] ss:$16 sps:$4 sm:$0xff]  }
 0x4f2   :  { %v999_v33 = vpop.f32.mrf.mxu0  ;;  %v1040_v34 = vpop.f32.mrf.mxu1  ;;  %v2729_v28 = vld [vmem:[#allocation3 + $0x8] ss:$16 sps:$4 sm:$0xff]  }
 0x4f3   :  { %1978 = vpow2.f32 %v1754_v29  ;;  %v1755_v35 = vmul.f32 -1.442695, %v1044_v32  ;;  %v1756_v45 = vmul.f32 -1.442695, %v1046_v41  ;;  %v2850_v32 = vld [vmem:[#allocation19_spill] sm:$0xff] }
 0x4f4   :  { %v1000_v36 = vpop.f32.mrf.mxu0  ;;  %v1041_v37 = vpop.f32.mrf.mxu1 }
 0x4f5   :  { %1980 = vpow2.f32 %v1755_v35  ;;  %v2851_v37 = vld [vmem:[#allocation21_spill] sm:$0xff] }
 0x4f6   :  { %1982 = vtanh.f32 %v1045_v44 }
 0x4f7   :  { %1984 = vpow2.f32 %v1756_v45 }
 0x500   :  { %v1979_v46 = vpop.eup %1978 }
 0x501   :  { %v1050_v47 = vadd.f32 1.0, %v1979_v46 }
 0x502   :  { %v1981_v48 = vpop.eup %1980 }
 0x503   :  { %1986 = vrcp.f32 %v1050_v47  ;;  %v1056_v14 = vadd.f32 1.0, %v1981_v48  ;;  %v1983_v15 = vpop.eup %1982  ;;  %v2852_v47 = vld [vmem:[#allocation22_spill] sm:$0xff]  ;;  %v2853_v48 = vld [vmem:[#allocation20_spill] sm:$0xff] }
 0x504   :  { %v1985_v16 = vpop.eup %1984 }
 0x505   :  { %1988 = vrcp.f32 %v1056_v14  ;;  %v1063_v54 = vadd.f32 1.0, %v1985_v16 }
 0x507   :  { %1990 = vrcp.f32 %v1063_v54 }
 0x510   :  { %v1987_v53 = vpop.eup %1986 }
 0x511   :  { %v1067_v58 = vmul.f32 %v1987_v53, %v1983_v15 }
 0x512   :  { %v1989_v27 = vpop.eup %1988 }
 0x513   :  { %v1066_v19 = vmul.f32 %v1989_v27, %v2591_v52  ;;  %v2699_v52 = vld [vmem:[#allocation3 + $0x4c] ss:$16 sps:$4 sm:$0xff]  }
 0x514   :  { %v1991_v60 = vpop.eup %1990 }
 0x515   :  { %v2649_v0 = vadd.f32 %v1067_v58, %v1066_v19 }
 0x517   :  { %1992 = vtanh.f32 %v2649_v0 }
 0x524   :  { %v1993_v62 = vpop.eup %1992 }
 0x525   :  { %v1070_v8 = vmul.f32 %v1993_v62, %v1991_v60 }
 0x527   :  { %v1076_v3 = vpack.c.bf16 %v1070_v8, %v1070_v8 }
 0x529   :  { %1110 = vmatmul.mubr.bf16.vlgmr.msra.gmra.mxu0 %v1076_v3  ;;  %1151 = vmatmul.mubr.bf16.vlgmr.msra.gmra.mxu1 %v1076_v3 }
 0x52a   :  { %1194 = vmatpush1.bf16.msra.mxu0 %v2594_v17  ;;  %1235 = vmatpush1.bf16.msra.mxu1 %v2597_v10 }
 0x52b   :  { %1195 = vmatprep.subr.bf16.mxu0 %v2600_v43  ;;  %1236 = vmatprep.subr.bf16.mxu1 %v2603_v11 }
 0x52c   :  { %1225 = vmatprep.mubr.bf16.mxu0 %v2840_v63  ;;  %1266 = vmatprep.mubr.bf16.mxu1 %v2840_v63 }
 0x52e   :  { %1196 = vmatpush1.bf16.msra.mxu0 %v2608_v12  ;;  %1237 = vmatpush1.bf16.msra.mxu1 %v2611_v13 }
 0x52f   :  { %1197 = vmatprep.subr.bf16.mxu0 %v2660_v9  ;;  %1238 = vmatprep.subr.bf16.mxu1 %v2663_v50 }
 0x532   :  { %1198 = vmatpush1.bf16.msra.mxu0 %v2666_v7  ;;  %1239 = vmatpush1.bf16.msra.mxu1 %v2669_v56 }
 0x533   :  { %1199 = vmatprep.subr.bf16.mxu0 %v2672_v57  ;;  %1240 = vmatprep.subr.bf16.mxu1 %v2675_v5 }
 0x536   :  { %1200 = vmatpush1.bf16.msra.mxu0 %v2678_v26  ;;  %1241 = vmatpush1.bf16.msra.mxu1 %v2681_v55 }
 0x537   :  { %1201 = vmatprep.subr.bf16.mxu0 %v2684_v39  ;;  %1242 = vmatprep.subr.bf16.mxu1 %v2687_v31 }
 0x53a   :  { %1202 = vmatpush1.bf16.msra.mxu0 %v2690_v59  ;;  %1243 = vmatpush1.bf16.msra.mxu1 %v2693_v4 }
 0x53b   :  { %1203 = vmatprep.subr.bf16.mxu0 %v2696_v61  ;;  %1244 = vmatprep.subr.bf16.mxu1 %v2699_v52 }
 0x53e   :  { %1204 = vmatpush1.bf16.msra.mxu0 %v2702_v2  ;;  %1245 = vmatpush1.bf16.msra.mxu1 %v2705_v6 }
 0x53f   :  { %1205 = vmatprep.subr.bf16.mxu0 %v2708_v38  ;;  %1246 = vmatprep.subr.bf16.mxu1 %v2711_v1 }
 0x542   :  { %1206 = vmatpush1.bf16.msra.mxu0 %v2714_v21  ;;  %1247 = vmatpush1.bf16.msra.mxu1 %v2717_v22 }
 0x543   :  { %1207 = vmatprep.subr.bf16.mxu0 %v2720_v23  ;;  %1248 = vmatprep.subr.bf16.mxu1 %v2723_v24 }
 0x546   :  { %1208 = vmatpush1.bf16.msra.mxu0 %v2726_v25  ;;  %1249 = vmatpush1.bf16.msra.mxu1 %v2729_v28 }
 0x547   :  { %1309 = vmatprep.subr.bf16.mxu0 %v2638_v18  ;;  %1350 = vmatprep.subr.bf16.mxu1 %v2641_v20 }
 0x5e9   :  { %v1111_v29 = vpop.f32.mrf.mxu0  ;;  %v1152_v30 = vpop.f32.mrf.mxu1 }
 0x5ea   :  { %v1159_v33 = vadd.f32 %v1111_v29, %v2850_v32  ;;  %v1161_v20 = vadd.f32 %v1152_v30, %v2853_v48  ;;  %v1892_v48 = vld [vmem:[#allocation5 + $0x7c] ss:$12 sps:$4 sm:$0xff]  }
 0x5eb   :  { %v1113_v34 = vpop.f32.mrf.mxu0  ;;  %v1154_v35 = vpop.f32.mrf.mxu1 }
 0x5ec   :  { %v1757_v36 = vmul.f32 -1.442695, %v1159_v33  ;;  %v1160_v40 = vadd.f32 %v1113_v34, %v2851_v37  ;;  %v1162_v18 = vadd.f32 %v1154_v35, %v2852_v47  ;;  %v1886_v47 = vld [vmem:[#allocation5 + $0x90] ss:$12 sps:$4 sm:$0xff]  }
 0x5ed   :  { %v1115_v41 = vpop.f32.mrf.mxu0  ;;  %v1156_v42 = vpop.f32.mrf.mxu1 }
 0x5ee   :  { %1994 = vpow2.f32 %v1757_v36  ;;  %v1758_v44 = vmul.f32 -1.442695, %v1160_v40  ;;  %v1759_v14 = vmul.f32 -1.442695, %v1162_v18  ;;  %v1884_v41 = vld [vmem:[#allocation5 + $0xac] ss:$12 sps:$4 sm:$0xff]  }
 0x5ef   :  { %v1116_v45 = vpop.f32.mrf.mxu0  ;;  %v1157_v46 = vpop.f32.mrf.mxu1  ;;  %v1882_v42 = vld [vmem:[#allocation5 + $0xa8] ss:$12 sps:$4 sm:$0xff]   ;;  %v1889_v18 = vld [vmem:[#allocation5 + $0x98] ss:$12 sps:$4 sm:$0xff]  }
 0x5f0   :  { %1996 = vpow2.f32 %v1758_v44  ;;  %v1885_v44 = vld [vmem:[#allocation5 + $0xb0] ss:$12 sps:$4 sm:$0xff]   ;;  %v2131_v45 = vmov 0.0   ;;  %v1888_v46 = vld [vmem:[#allocation5 + $0x94] ss:$12 sps:$4 sm:$0xff]  }
 0x5f1   :  { %1998 = vtanh.f32 %v1161_v20  ;;  %v1890_v20 = vld [vmem:[#allocation5 + $0x78] ss:$12 sps:$4 sm:$0xff]  }
 0x5f2   :  { %2000 = vpow2.f32 %v1759_v14  ;;  %v1893_v14 = vld [vmem:[#allocation5 + $0x80] ss:$12 sps:$4 sm:$0xff]  }
 0x5fb   :  { %v1995_v15 = vpop.eup %1994 }
 0x5fc   :  { %v1166_v16 = vadd.f32 1.0, %v1995_v15  ;;  %v1894_v15 = vld [vmem:[#allocation5 + $0x60] ss:$12 sps:$4 sm:$0xff]  }
 0x5fd   :  { %v1997_v53 = vpop.eup %1996 }
 0x5fe   :  { %2002 = vrcp.f32 %v1166_v16  ;;  %v1172_v58 = vadd.f32 1.0, %v1997_v53  ;;  %v1999_v27 = vpop.eup %1998  ;;  %v1897_v16 = vld [vmem:[#allocation5 + $0x68] ss:$12 sps:$4 sm:$0xff]   ;;  %v1900_v53 = vld [vmem:[#allocation5 + $0x4c] ss:$12 sps:$4 sm:$0xff]  }
 0x5ff   :  { %v2001_v54 = vpop.eup %2000 }
 0x600   :  { %2004 = vrcp.f32 %v1172_v58  ;;  %v1179_v8 = vadd.f32 1.0, %v2001_v54  ;;  %v1898_v58 = vld [vmem:[#allocation5 + $0x48] ss:$12 sps:$4 sm:$0xff]  }
 0x601   :  { %v1904_v54 = vld [vmem:[#allocation5 + $0x34] ss:$12 sps:$4 sm:$0xff]  }
 0x602   :  { %2006 = vrcp.f32 %v1179_v8  ;;  %v1906_v8 = vld [vmem:[#allocation5 + $0x18] ss:$12 sps:$4 sm:$0xff]  }
 0x60b   :  { %v2003_v19 = vpop.eup %2002 }
 0x60c   :  { %v1183_v60 = vmul.f32 %v2003_v19, %v1999_v27  ;;  %v1901_v27 = vld [vmem:[#allocation5 + $0x50] ss:$12 sps:$4 sm:$0xff]  }
 0x60d   :  { %v2005_v62 = vpop.eup %2004  ;;  %v1902_v19 = vld [vmem:[#allocation5 + $0x30] ss:$12 sps:$4 sm:$0xff]  }
 0x60e   :  { %v1182_v3 = vmul.f32 %v2005_v62, %v2649_v0  ;;  %v1908_v62 = vld [vmem:[#allocation5 + $0x1c] ss:$12 sps:$4 sm:$0xff]  }
 0x60f   :  { %v2007_v30 = vpop.eup %2006 }
 0x610   :  { %v2739_v29 = vadd.f32 %v1183_v60, %v1182_v3  ;;  %v1905_v60 = vld [vmem:[#allocation5 + $0x38] ss:$12 sps:$4 sm:$0xff]   ;;  %v1909_v3 = vld [vmem:[#allocation5 + $0x20] ss:$12 sps:$4 sm:$0xff]  }
 0x612   :  { %2008 = vtanh.f32 %v2739_v29 }
 0x61f   :  { %v2009_v32 = vpop.eup %2008 }
 0x620   :  { %v1186_v33 = vmul.f32 %v2009_v32, %v2007_v30  ;;  %v1910_v30 = vld [vmem:[#allocation5] ss:$12 sps:$4 sm:$0xff]   ;;  %v1913_v32 = vld [vmem:[#allocation5 + $0x8] ss:$12 sps:$4 sm:$0xff]  }
 0x622   :  { %v1192_v34 = vpack.c.bf16 %v1186_v33, %v1186_v33 }
 0x624   :  { %1226 = vmatmul.mubr.bf16.vlgmr.msra.gmra.mxu0 %v1192_v34  ;;  %1267 = vmatmul.mubr.bf16.vlgmr.msra.gmra.mxu1 %v1192_v34 }
 0x625   :  { %1310 = vmatpush1.bf16.msra.mxu0 %v2594_v17  ;;  %1351 = vmatpush1.bf16.msra.mxu1 %v2597_v10 }
 0x626   :  { %1311 = vmatprep.subr.bf16.mxu0 %v2600_v43  ;;  %1352 = vmatprep.subr.bf16.mxu1 %v2603_v11  ;;  %v2854_v43 = vld [vmem:[#allocation23_spill] sm:$0xff] }
 0x627   :  { %1341 = vmatprep.mubr.bf16.mxu0 %v2840_v63  ;;  %1382 = vmatprep.mubr.bf16.mxu1 %v2840_v63 }
 0x629   :  { %1312 = vmatpush1.bf16.msra.mxu0 %v2608_v12  ;;  %1353 = vmatpush1.bf16.msra.mxu1 %v2611_v13 }
 0x62a   :  { %1313 = vmatprep.subr.bf16.mxu0 %v2660_v9  ;;  %1354 = vmatprep.subr.bf16.mxu1 %v2663_v50  ;;  %v2855_v9 = vld [vmem:[#allocation25_spill] sm:$0xff] }
 0x62d   :  { %1314 = vmatpush1.bf16.msra.mxu0 %v2666_v7  ;;  %1355 = vmatpush1.bf16.msra.mxu1 %v2669_v56 }
 0x62e   :  { %1315 = vmatprep.subr.bf16.mxu0 %v2672_v57  ;;  %1356 = vmatprep.subr.bf16.mxu1 %v2675_v5 }
 0x631   :  { %1316 = vmatpush1.bf16.msra.mxu0 %v2678_v26  ;;  %1357 = vmatpush1.bf16.msra.mxu1 %v2681_v55  ;;  %v2856_v55 = vld [vmem:[#allocation26_spill] sm:$0xff] }
 0x632   :  { %1317 = vmatprep.subr.bf16.mxu0 %v2684_v39  ;;  %1358 = vmatprep.subr.bf16.mxu1 %v2687_v31  ;;  %v2857_v31 = vld [vmem:[#allocation24_spill] sm:$0xff] }
 0x635   :  { %1318 = vmatpush1.bf16.msra.mxu0 %v2690_v59  ;;  %1359 = vmatpush1.bf16.msra.mxu1 %v2693_v4 }
 0x636   :  { %1319 = vmatprep.subr.bf16.mxu0 %v2696_v61  ;;  %1360 = vmatprep.subr.bf16.mxu1 %v2699_v52 }
 0x639   :  { %1320 = vmatpush1.bf16.msra.mxu0 %v2702_v2  ;;  %1361 = vmatpush1.bf16.msra.mxu1 %v2705_v6 }
 0x63a   :  { %1321 = vmatprep.subr.bf16.mxu0 %v2708_v38  ;;  %1362 = vmatprep.subr.bf16.mxu1 %v2711_v1 }
 0x63d   :  { %1322 = vmatpush1.bf16.msra.mxu0 %v2714_v21  ;;  %1363 = vmatpush1.bf16.msra.mxu1 %v2717_v22 }
 0x63e   :  { %1323 = vmatprep.subr.bf16.mxu0 %v2720_v23  ;;  %1364 = vmatprep.subr.bf16.mxu1 %v2723_v24 }
 0x641   :  { %1324 = vmatpush1.bf16.msra.mxu0 %v2726_v25  ;;  %1365 = vmatpush1.bf16.msra.mxu1 %v2729_v28 }
 0x642   :  { %1597 = vmatprep.subr.bf16.mxu0 %v1884_v41  ;;  %1799 = vmatprep.subr.bf16.mxu1 %v2131_v45 }
 0x6e4   :  { %v1227_v17 = vpop.f32.mrf.mxu0  ;;  %v1268_v10 = vpop.f32.mrf.mxu1 }
 0x6e5   :  { %v1275_v11 = vadd.f32 %v1227_v17, %v2854_v43  ;;  %v1277_v59 = vadd.f32 %v1268_v10, %v2857_v31  ;;  %v2858_v17 = vld [vmem:[#allocation27_spill] sm:$0xff] }
 0x6e6   :  { %v1229_v12 = vpop.f32.mrf.mxu0  ;;  %v1270_v13 = vpop.f32.mrf.mxu1 }
 0x6e7   :  { %v1760_v0 = vmul.f32 -1.442695, %v1275_v11  ;;  %v1276_v50 = vadd.f32 %v1229_v12, %v2855_v9  ;;  %v1278_v39 = vadd.f32 %v1270_v13, %v2856_v55 }
 0x6e8   :  { %v1231_v7 = vpop.f32.mrf.mxu0  ;;  %v1272_v56 = vpop.f32.mrf.mxu1 }
 0x6e9   :  { %2010 = vpow2.f32 %v1760_v0  ;;  %v1761_v57 = vmul.f32 -1.442695, %v1276_v50  ;;  %v1762_v4 = vmul.f32 -1.442695, %v1278_v39 }
 0x6ea   :  { %v1232_v5 = vpop.f32.mrf.mxu0  ;;  %v1273_v26 = vpop.f32.mrf.mxu1 }
 0x6eb   :  { %2012 = vpow2.f32 %v1761_v57  ;;  %v2859_v5 = vld [vmem:[#allocation28_spill] sm:$0xff] }
 0x6ec   :  { %2014 = vtanh.f32 %v1277_v59 }
 0x6ed   :  { %2016 = vpow2.f32 %v1762_v4 }
 0x6f6   :  { %v2011_v61 = vpop.eup %2010 }
 0x6f7   :  { %v1282_v52 = vadd.f32 1.0, %v2011_v61 }
 0x6f8   :  { %v2013_v2 = vpop.eup %2012 }
 0x6f9   :  { %2018 = vrcp.f32 %v1282_v52  ;;  %v1288_v6 = vadd.f32 1.0, %v2013_v2  ;;  %v2015_v38 = vpop.eup %2014 }
 0x6fa   :  { %v2017_v1 = vpop.eup %2016 }
 0x6fb   :  { %2020 = vrcp.f32 %v1288_v6  ;;  %v1295_v24 = vadd.f32 1.0, %v2017_v1 }
 0x6fd   :  { %2022 = vrcp.f32 %v1295_v24 }
 0x706   :  { %v2019_v21 = vpop.eup %2018 }
 0x707   :  { %v1299_v22 = vmul.f32 %v2019_v21, %v2015_v38 }
 0x708   :  { %v2021_v23 = vpop.eup %2020 }
 0x709   :  { %v1298_v25 = vmul.f32 %v2021_v23, %v2739_v29  ;;  %v1912_v29 = vld [vmem:[#allocation5 + $0x4] ss:$12 sps:$4 sm:$0xff]  }
 0x70a   :  { %v2023_v35 = vpop.eup %2022 }
 0x70b   :  { %v2779_v28 = vadd.f32 %v1299_v22, %v1298_v25  ;;  %v1452_v25 = vld [vmem:[%s2811_s5] sm:$0x7] }
 0x70d   :  { %2024 = vtanh.f32 %v2779_v28 }
 0x71a   :  { %v2025_v36 = vpop.eup %2024 }
 0x71b   :  { %v1302_v37 = vmul.f32 %v2025_v36, %v2023_v35  ;;  %v2860_v35 = vld [vmem:[#allocation9_spill] sm:$0xff] }
 0x71c   :  { %v2861_v36 = vsub.s32 0, %v2860_v35 }
 0x71d   :  { %v1308_v40 = vpack.c.bf16 %v1302_v37, %v1302_v37 }
 0x71e   :  { %v1457_v37 = vrot.slane %v1452_v25, %v2861_v36 }
 0x71f   :  { %1342 = vmatmul.mubr.bf16.vlgmr.msra.gmra.mxu0 %v1308_v40  ;;  %1383 = vmatmul.mubr.bf16.vlgmr.msra.gmra.mxu1 %v1308_v40  ;;  %v2862_v40 = vsub.s32 2, %v2860_v35 }
 0x720   :  { %1629 = vmatprep.mubr.bf16.mxu0 %v2840_v63  ;;  %1598 = vmatpush1.bf16.msra.mxu0 %v1882_v42  ;;  %v1896_v63 = vld [vmem:[#allocation5 + $0x64] ss:$12 sps:$4 sm:$0xff]  }
 0x721   :  { %1800 = vmatpush3.bf16.msra.mxu1 %v1885_v44  ;;  %1599 = vmatprep.subr.bf16.mxu0 %v1888_v46  ;;  %v1465_v41 = vrot.slane %v1452_v25, %v2862_v40 }
 0x722   :  { %1801 = vmatprep.subr.bf16.mxu1 %v2131_v45  ;;  %1815 = vmatprep.mubr.msk.bf16.mxu1 %vm2132_vm1, %v2131_v45 }
 0x724   :  { %1600 = vmatpush1.bf16.msra.mxu0 %v1886_v47 }
 0x725   :  { %1802 = vmatpush3.bf16.msra.mxu1 %v1889_v18  ;;  %1601 = vmatprep.subr.bf16.mxu0 %v1892_v48 }
 0x726   :  { %1803 = vmatprep.subr.bf16.mxu1 %v2131_v45 }
 0x728   :  { %1602 = vmatpush1.bf16.msra.mxu0 %v1890_v20 }
 0x729   :  { %1804 = vmatpush3.bf16.msra.mxu1 %v1893_v14  ;;  %1603 = vmatprep.subr.bf16.mxu0 %v1896_v63 }
 0x72a   :  { %1805 = vmatprep.subr.bf16.mxu1 %v2131_v45 }
 0x72c   :  { %1604 = vmatpush1.bf16.msra.mxu0 %v1894_v15 }
 0x72d   :  { %1806 = vmatpush3.bf16.msra.mxu1 %v1897_v16  ;;  %1605 = vmatprep.subr.bf16.mxu0 %v1900_v53 }
 0x72e   :  { %1807 = vmatprep.subr.bf16.mxu1 %v2131_v45 }
 0x730   :  { %1606 = vmatpush1.bf16.msra.mxu0 %v1898_v58 }
 0x731   :  { %1808 = vmatpush3.bf16.msra.mxu1 %v1901_v27  ;;  %1607 = vmatprep.subr.bf16.mxu0 %v1904_v54 }
 0x732   :  { %1809 = vmatprep.subr.bf16.mxu1 %v2131_v45 }
 0x734   :  { %1608 = vmatpush1.bf16.msra.mxu0 %v1902_v19 }
 0x735   :  { %1810 = vmatpush3.bf16.msra.mxu1 %v1905_v60  ;;  %1609 = vmatprep.subr.bf16.mxu0 %v1908_v62 }
 0x736   :  { %1811 = vmatprep.subr.bf16.mxu1 %v2131_v45 }
 0x738   :  { %1610 = vmatpush1.bf16.msra.mxu0 %v1906_v8 }
 0x739   :  { %1812 = vmatpush3.bf16.msra.mxu1 %v1909_v3  ;;  %1611 = vmatprep.subr.bf16.mxu0 %v1912_v29 }
 0x73a   :  { %1813 = vmatprep.subr.bf16.mxu1 %v2131_v45 }
 0x73c   :  { %1612 = vmatpush1.bf16.msra.mxu0 %v1910_v30 }
 0x73d   :  { %1814 = vmatpush3.bf16.msra.mxu1 %v1913_v32 }
 0x7df   :  { %v1343_v33 = vpop.f32.mrf.mxu0  ;;  %v1384_v34 = vpop.f32.mrf.mxu1 }
 0x7e0   :  { %v1391_v10 = vadd.f32 %v1343_v33, %v2858_v17  ;;  %v1393_v26 = vadd.f32 %v1384_v34, %v2859_v5 }
 0x7e1   :  { %v1345_v43 = vpop.f32.mrf.mxu0  ;;  %v1386_v11 = vpop.f32.mrf.mxu1 }
 0x7e2   :  { %v1763_v12 = vmul.f32 -1.442695, %v1391_v10  ;;  %v1392_v13 = vadd.f32 %v1345_v43, %v2455_v51  ;;  %v1394_v57 = vadd.f32 %v1386_v11, %v2458_v49 }
 0x7e3   :  { %v1347_v0 = vpop.f32.mrf.mxu0  ;;  %v1388_v9 = vpop.f32.mrf.mxu1 }
 0x7e4   :  { %2026 = vpow2.f32 %v1763_v12  ;;  %v1764_v50 = vmul.f32 -1.442695, %v1392_v13  ;;  %v1765_v55 = vmul.f32 -1.442695, %v1394_v57 }
 0x7e5   :  { %v1348_v7 = vpop.f32.mrf.mxu0  ;;  %v1389_v56 = vpop.f32.mrf.mxu1 }
 0x7e6   :  { %2028 = vpow2.f32 %v1764_v50 }
 0x7e7   :  { %2030 = vtanh.f32 %v1393_v26 }
 0x7e8   :  { %2032 = vpow2.f32 %v1765_v55 }
 0x7f1   :  { %v2027_v39 = vpop.eup %2026 }
 0x7f2   :  { %v1398_v31 = vadd.f32 1.0, %v2027_v39 }
 0x7f3   :  { %v2029_v59 = vpop.eup %2028 }
 0x7f4   :  { %2034 = vrcp.f32 %v1398_v31  ;;  %v1404_v4 = vadd.f32 1.0, %v2029_v59  ;;  %v2031_v51 = vpop.eup %2030 }
 0x7f5   :  { %v2033_v61 = vpop.eup %2032 }
 0x7f6   :  { %2036 = vrcp.f32 %v1404_v4  ;;  %v1411_v38 = vadd.f32 1.0, %v2033_v61 }
 0x7f8   :  { %2038 = vrcp.f32 %v1411_v38 }
 0x801   :  { %v2035_v52 = vpop.eup %2034 }
 0x802   :  { %v1415_v2 = vmul.f32 %v2035_v52, %v2031_v51 }
 0x803   :  { %v2037_v6 = vpop.eup %2036 }
 0x804   :  { %v1414_v1 = vmul.f32 %v2037_v6, %v2779_v28  ;;  %v2863_v28 = vsub.s32 1, %v2860_v35 }
 0x805   :  { %v2039_v21 = vpop.eup %2038 }
 0x806   :  { %v1416_v49 = vadd.f32 %v1415_v2, %v1414_v1  ;;  %v1461_v42 = vrot.slane %v1452_v25, %v2863_v28 }
 0x808   :  { %2040 = vtanh.f32 %v1416_v49 }
 0x815   :  { %v2041_v22 = vpop.eup %2040 }
 0x816   :  { %v1418_v23 = vmul.f32 %v2041_v22, %v2039_v21 }
 0x818   :  { %v1419_v24 = vpack.c.bf16 %v1418_v23, %v1418_v23 }
 0x81a   :  { %1630 = vmatmul.mubr.bf16.vlgmr.msra.gmra.mxu0 %v1419_v24  ;;  %1816 = vmatmul.mubr.bf16.vlgmr.msra.gmra.mxu1 %v1419_v24 }
 0x8da   :  { %v1631_v44 = vpop.f32.mrf.mxu0  ;;  %v1672_v45 = vpop.f32.mrf.mxu1 }
 0x8db   :  { %v1632_v46 = vadd.f32 %v1631_v44, %v1457_v37  ;;  %v1673_v47 = vadd.f32 %v1672_v45, %v1465_v41 }
 0x8dc   :  { %v1633_v18 = vpop.f32.mrf.mxu0  ;;  %v1817_v48 = vpop.f32.mrf.mxu1 }
 0x8dd   :  { %v1687_v20 = vmul.f32 1.442695, %v1673_v47  ;;  %v1634_v14 = vadd.f32 %v1633_v18, %v1461_v42  ;;  %1678 = vmax.xlane.f32.xlu0 %v1632_v46 }
 0x8de   :  { %v1635_v63 = vpop.f32.mrf.mxu0  ;;  %v1675_v15 = vpop.f32.mrf.mxu1 }
 0x8df   :  { %2042 = vpow2.f32 %v1687_v20  ;;  %1690 = vst [vmem:[%s2812_s6 + $0x8] sm:$0xff] %v1634_v14 }
 0x8e0   :  { %v1636_v16 = vpop.f32.mrf.mxu0  ;;  %v1818_v53 = vpop.f32.mrf.mxu1 }
 0x8ec   :  { %v2043_v58 = vpop.eup %2042 }
 0x8ed   :  { %1691 = vst [vmem:[%s2812_s6 + $0x10] sm:$0xff] %v2043_v58 }
 0x966   :  { %v1679_v27 = vpop.xlane.xlu0 %1678 }
 0x967   :  { %v1680_v54 = vsub.f32 %v1632_v46, %v1679_v27 }
 0x969   :  { %v1681_v19 = vmul.f32 1.442695, %v1680_v54 }
 0x96b   :  { %2044 = vpow2.f32 %v1681_v19 }
 0x978   :  { %v2045_v60 = vpop.eup %2044 }
 0x979   :  { %1683 = vadd.xlane.f32.xlu0 %v2045_v60 }
 0xa02   :  { %v1684_v62 = vpop.xlane.xlu0 %1683 }
 0xa03   :  { %2046 = vrcp.f32 %v1684_v62 }
 0xa10   :  { %v2047_v8 = vpop.eup %2046 }
 0xa11   :  { %v1686_v3 = vmul.f32 %v2047_v8, %v2045_v60 }
 0xa13   :  { %1689 = vst [vmem:[%s2812_s6] sm:$0xff] %v1686_v3 }
 0xa14   :  { %1696 = vsyncpa [#allocation4], 1 }
 0xa15   :  { %1697 = vsyncpa [#allocation6], 1 }

</bundles_post_ra>
